<compile_context>
chip_gen: v7x
topology: tpu7x:2x2x1
jax: 0.10.0
libtpu: 0.0.40
codegen_flags: <defaults>
</compile_context>

<pallas_src>
import math

import jax
import jax.numpy as jnp
from jax.experimental import pallas as pl
from jax.experimental.pallas import tpu as pltpu

EPS = 1e-5          # torch.nn.LayerNorm default
NEG_INF = -1e30     # stands in for masked_fill(-inf); exp underflows to exactly 0


def _layer_norm(x, g, b):
    mu = jnp.mean(x, axis=-1, keepdims=True)
    var = jnp.mean((x - mu) ** 2, axis=-1, keepdims=True)
    return (x - mu) * jax.lax.rsqrt(var + EPS) * g + b


def fused_encoder_kernel(x_ref, pos_bias_ref, kpm_ref,
                         wqkv_ref, bqkv_ref, wo_ref, bo_ref,
                         ln1g_ref, ln1b_ref, w1_ref, b1_ref, w2_ref, b2_ref,
                         ln2g_ref, ln2b_ref,
                         out_ref, x_scr):
    """Grid = (batch_tile, layer).  One step = one full encoder layer over a
    tile of whole sequences.  x_scr (Nt, C) f32 carries the residual stream
    across the layer axis."""
    layer = pl.program_id(1)

    @pl.when(layer == 0)
    def _():
        x_scr[...] = x_ref[0]           # load embeddings for this batch tile

    x = x_scr[...]                      # (Nt, C) f32 residual stream
    nt, c = x.shape
    hn = pos_bias_ref.shape[0]          # heads
    t = pos_bias_ref.shape[1]           # sequence length
    bt = nt // t                        # sequences in this tile
    dh = c // hn
    g = hn * bt                         # (head, sequence) groups

    # ---- fused QKV projection: one (Nt,C)@(C,3C) matmul, f32 accumulation ----
    xb = x.astype(jnp.bfloat16)
    qkv = jnp.dot(xb, wqkv_ref[0], preferred_element_type=jnp.float32) + bqkv_ref[0]

    def split_heads(sec):
        # lane-slice each head out of section `sec` (0=q,1=k,2=v) and stack to
        # (G, T, Dh) with group index g = h*Bt + b  (head-major)
        parts = [qkv[:, sec * c + i * dh: sec * c + (i + 1) * dh].reshape(bt, t, dh)
                 for i in range(hn)]
        return jnp.concatenate(parts, axis=0).astype(jnp.bfloat16)

    q = split_heads(0)                  # 1/sqrt(Dh) already folded into wq/bq
    k = split_heads(1)
    v = split_heads(2)

    # ---- attention scores + bias (f32) ----
    s = jnp.einsum('gqd,gkd->gqk', q, k, preferred_element_type=jnp.float32)
    s4 = s.reshape(hn, bt, t, t)
    s4 = (s4 + pos_bias_ref[...].astype(jnp.float32)[:, None, :, :]   # rel-pos bias
              + kpm_ref[0][None, :, None, :])                          # key-pad mask
    s = s4.reshape(g, t, t)

    # ---- softmax, normalization deferred until after PV ----
    s = s - jnp.max(s, axis=-1, keepdims=True)
    p = jnp.exp(s)
    l = jnp.sum(p, axis=-1, keepdims=True)                             # (G, T, 1)

    ctx = jnp.einsum('gqk,gkd->gqd', p.astype(jnp.bfloat16), v,
                     preferred_element_type=jnp.float32)
    ctx = ctx * pl.reciprocal(l, approx=True)                          # (G, T, Dh)

    # ---- merged output projection: (Nt, H*Dh) @ (C, C) ----
    ctx3 = ctx.reshape(hn, nt, dh)                                     # leading regroup only
    ctx_flat = jnp.concatenate([ctx3[i] for i in range(hn)], axis=-1)  # (Nt, C), col = h*Dh+d
    attn = jnp.dot(ctx_flat.astype(jnp.bfloat16), wo_ref[0],
                   preferred_element_type=jnp.float32) + bo_ref[0]

    # post-norm residual (normalize_before=False); dropout = identity (eval)
    x1 = _layer_norm(x + attn, ln1g_ref[0], ln1b_ref[0])

    # ---- feed-forward network (ReLU) ----
    hid = jnp.maximum(
        jnp.dot(x1.astype(jnp.bfloat16), w1_ref[0],
                preferred_element_type=jnp.float32) + b1_ref[0], 0.0)
    ffn = jnp.dot(hid.astype(jnp.bfloat16), w2_ref[0],
                  preferred_element_type=jnp.float32) + b2_ref[0]
    x2 = _layer_norm(x1 + ffn, ln2g_ref[0], ln2b_ref[0])

    x_scr[...] = x2                           # carry to next layer
    out_ref[0, 0] = x2.astype(out_ref.dtype)  # inner state for this layer (bf16)


# ---------------- generation-aware tuning helpers ----------------

def _device_kind():
    try:
        return jax.devices()[0].device_kind.lower()
    except Exception:
        return ""


def _vmem_limit_bytes(kind):
    if "v7" in kind or "7x" in kind:
        return 48 * 1024 * 1024       # v7x: 64 MiB physical per TC -> leave headroom
    if "v5" in kind or "v6" in kind:
        return 100 * 1024 * 1024      # v5e/v6e: 128 MiB physical
    return None                       # unknown chip: keep compiler default


def _pick_batch_tile(batch, seq_len, *, target_rows=1024, min_outer=1):
    """Smallest divisor Bt of `batch` whose row count reaches target_rows
    (whole batch if nothing does), then shrunk if needed so that
    B_outer = batch // Bt >= min_outer (keeps every TensorCore busy on v7x)."""
    best = batch
    for bt in range(1, batch + 1):
        if batch % bt == 0 and bt * seq_len >= target_rows:
            best = bt
            break
    while min_outer > 1 and best > 1 and (batch // best) < min_outer:
        best -= 1
        while best > 1 and batch % best != 0:
            best -= 1
    return max(best, 1)


# ---------------- pallas_call wrapper ----------------

def fused_encoder_pallas(x_btc, pos_bias, kp_mask, stacked, *, batch_tile,
                         out_dtype=jnp.bfloat16):
    """x_btc: (B,T,C) f32; pos_bias: (H,T,T) bf16; kp_mask: (B,T) f32 additive;
    stacked: dict of (L, ...) weight arrays.  Returns (L, B, T, C) out_dtype."""
    B, T, C = x_btc.shape
    L = stacked["wqkv"].shape[0]
    Bt = batch_tile
    B_outer = B // Bt
    Nt = Bt * T

    x_in = x_btc.reshape(B_outer, Nt, C)
    kp = kp_mask.reshape(B_outer, Bt, T)

    weight_names = ("wqkv", "bqkv", "wo", "bo", "ln1_g", "ln1_b",
                    "w1", "b1", "w2", "b2", "ln2_g", "ln2_b")
    weights = [stacked[n] for n in weight_names]

    def layer_spec(a):
        nd = a.ndim
        return pl.BlockSpec((1,) + a.shape[1:],
                            lambda bo, l, _n=nd: (l,) + (0,) * (_n - 1))

    in_specs = ([pl.BlockSpec((1, Nt, C), lambda bo, l: (bo, 0, 0)),
                 # constant index_map: bias stays resident across both grid axes
                 pl.BlockSpec(pos_bias.shape, lambda bo, l: (0, 0, 0)),
                 pl.BlockSpec((1, Bt, T), lambda bo, l: (bo, 0, 0))]
                + [layer_spec(w) for w in weights])

    out = pl.pallas_call(
        fused_encoder_kernel,
        out_shape=jax.ShapeDtypeStruct((L, B_outer, Nt, C), out_dtype),
        grid=(B_outer, L),
        in_specs=in_specs,
        out_specs=pl.BlockSpec((1, 1, Nt, C), lambda bo, l: (l, bo, 0, 0)),
        scratch_shapes=[pltpu.VMEM((Nt, C), jnp.float32)],
        compiler_params=pltpu.CompilerParams(
            dimension_semantics=("parallel", "arbitrary"),
            vmem_limit_bytes=_vmem_limit_bytes(_device_kind())),
    )(x_in, pos_bias, kp, *weights)

    return out.reshape(L, B, T, C)


# ---------------- host-side glue (embeddings, position bias, packing) ----------------

def relative_position_bucket(relative_position, num_buckets, max_distance):
    ret = jnp.zeros_like(relative_position)
    n = -relative_position
    num_buckets //= 2
    ret = ret + (n < 0).astype(jnp.int32) * num_buckets
    n = jnp.abs(n)
    max_exact = num_buckets // 2
    is_small = n < max_exact
    n_safe = jnp.maximum(n, 1).astype(jnp.float32)
    val_if_large = max_exact + (
        jnp.log(n_safe / max_exact) / math.log(max_distance / max_exact)
        * (num_buckets - max_exact)).astype(jnp.int32)
    val_if_large = jnp.minimum(val_if_large, num_buckets - 1)
    return ret + jnp.where(is_small, n, val_if_large)


def compute_position_bias(seq_len, rel_bias_table, num_buckets, max_distance):
    ctx = jnp.arange(seq_len)[:, None]
    mem = jnp.arange(seq_len)[None, :]
    rel = mem - ctx
    buckets = relative_position_bucket(rel, num_buckets, max_distance)
    values = rel_bias_table[buckets]          # (T, T, H)
    return jnp.transpose(values, (2, 0, 1))   # (H, T, T)


def _pack_layer_params(layers, num_heads):
    """Stack per-layer params along L, fuse Wq|Wk|Wv into one (C,3C) weight,
    fold 1/sqrt(Dh) into Wq/bq, and cast matmul weights to bf16 (biases/LN f32)."""
    L = len(layers)
    C = layers[0]["wq"].shape[0]
    Dh = C // num_heads
    scaling = 1.0 / math.sqrt(Dh)
    bf = jnp.bfloat16

    def stack(name):
        return jnp.stack([lp[name] for lp in layers], axis=0)   # (L, ...)

    wqkv = jnp.concatenate([stack("wq") * scaling, stack("wk"), stack("wv")],
                           axis=-1)                                    # (L, C, 3C)
    bqkv = jnp.concatenate([stack("bq") * scaling, stack("bk"), stack("bv")],
                           axis=-1)                                    # (L, 1, 3C)

    return dict(
        wqkv=wqkv.astype(bf), bqkv=bqkv,
        wo=stack("wo").astype(bf), bo=stack("bo"),
        ln1_g=stack("ln1_g"), ln1_b=stack("ln1_b"),
        w1=stack("w1").astype(bf), b1=stack("b1"),
        w2=stack("w2").astype(bf), b2=stack("b2"),
        ln2_g=stack("ln2_g"), ln2_b=stack("ln2_b"),
    )


def sentence_encoder_forward(params, tokens, segment_labels=None):
    pad = params["padding_idx"]
    padding_mask = (tokens == pad)

    # token embeddings (padding row is zero)
    x = params["embed_tokens"][tokens]

    # learned positional embeddings, offset by padding (fairseq make_positions)
    nonpad = (tokens != pad).astype(jnp.int32)
    positions = jnp.cumsum(nonpad, axis=1) * nonpad + pad
    x = x + params["embed_positions"][positions]

    # segment embeddings
    if segment_labels is not None:
        x = x + params["segment_embeddings"][segment_labels]

    # emb_layer_norm is None (encoder_normalize_before=False); dropout is eval no-op
    x = x * (1.0 - padding_mask[..., None].astype(x.dtype))

    B, T = tokens.shape
    H = params["num_heads"]

    # relative-position bias: one small (H,T,T) bf16 block, resident in VMEM
    pos_bias = compute_position_bias(
        T, params["relative_attention_bias"],
        params["num_buckets"], params["max_distance"]).astype(jnp.bfloat16)
    # key-padding mask as a tiny additive (B,T) term, fused with the bias in-kernel
    kp_neg = NEG_INF * padding_mask.astype(jnp.float32)

    kind = _device_kind()
    min_outer = 2 if ("v7" in kind or "7x" in kind) else 1   # 2 TCs/chip on v7x
    Bt = _pick_batch_tile(B, T, target_rows=1024, min_outer=min_outer)

    stacked = _pack_layer_params(params["layers"], H)
    layer_out = fused_encoder_pallas(x, pos_bias, kp_neg, stacked,
                                     batch_tile=Bt)          # (L, B, T, C) bf16

    inner_states = [x] + [layer_out[i] for i in range(layer_out.shape[0])]
    sentence_rep = layer_out[-1][:, 0, :]
    return inner_states, sentence_rep


# ---------------- deterministic parameter construction ----------------

def init_params(key, vocab_size=50, padding_idx=1, num_layers=2,
                embed_dim=32, ffn_dim=64, num_heads=4, max_seq_len=16,
                num_segments=2):
    base_context, base_buckets, base_maxdist = 512, 32, 128
    nb = max(32, int(base_buckets * max_seq_len / base_context))
    num_buckets = (nb + 7) // 8 * 8
    md = max(128, int(base_maxdist * max_seq_len / base_context))
    max_distance = (md + 7) // 8 * 8

    keys = jax.random.split(key, 4 + num_layers)

    def nrm(k, shape, scale=0.02):
        return scale * jax.random.normal(k, shape, dtype=jnp.float32)

    embed_tokens = nrm(keys[0], (vocab_size, embed_dim)).at[padding_idx].set(0.0)
    embed_positions = nrm(keys[1], (max_seq_len + padding_idx + 1, embed_dim)
                          ).at[padding_idx].set(0.0)
    segment_embeddings = nrm(keys[2], (num_segments, embed_dim))
    relative_attention_bias = nrm(keys[3], (num_buckets, num_heads))

    layers = []
    for li in range(num_layers):
        lk = jax.random.split(keys[4 + li], 6)
        layers.append(dict(
            wq=nrm(lk[0], (embed_dim, embed_dim)), bq=jnp.zeros((1, embed_dim), jnp.float32),
            wk=nrm(lk[1], (embed_dim, embed_dim)), bk=jnp.zeros((1, embed_dim), jnp.float32),
            wv=nrm(lk[2], (embed_dim, embed_dim)), bv=jnp.zeros((1, embed_dim), jnp.float32),
            wo=nrm(lk[3], (embed_dim, embed_dim)), bo=jnp.zeros((1, embed_dim), jnp.float32),
            ln1_g=jnp.ones((1, embed_dim), jnp.float32),
            ln1_b=jnp.zeros((1, embed_dim), jnp.float32),
            w1=nrm(lk[4], (embed_dim, ffn_dim)), b1=jnp.zeros((1, ffn_dim), jnp.float32),
            w2=nrm(lk[5], (ffn_dim, embed_dim)), b2=jnp.zeros((1, embed_dim), jnp.float32),
            ln2_g=jnp.ones((1, embed_dim), jnp.float32),
            ln2_b=jnp.zeros((1, embed_dim), jnp.float32),
        ))
    return dict(padding_idx=padding_idx, embed_tokens=embed_tokens,
                embed_positions=embed_positions,
                segment_embeddings=segment_embeddings,
                relative_attention_bias=relative_attention_bias,
                num_buckets=num_buckets, max_distance=max_distance,
                num_heads=num_heads, layers=layers)


if __name__ == "__main__":
    key = jax.random.PRNGKey(0)
    pkey, tkey = jax.random.split(key)

    B, T = 2, 8
    padding_idx = 1
    params = init_params(pkey, vocab_size=50, padding_idx=padding_idx,
                         num_layers=2, embed_dim=32, ffn_dim=64,
                         num_heads=4, max_seq_len=16, num_segments=2)

    tokens = jax.random.randint(tkey, (B, T), 2, 50, dtype=jnp.int32)
    tokens = tokens.at[1, T - 2:].set(padding_idx)   # some padding in second sequence
    segment_labels = jnp.concatenate(
        [jnp.zeros((B, T // 2), jnp.int32), jnp.ones((B, T - T // 2), jnp.int32)], axis=1)

    inner_states, sentence_rep = sentence_encoder_forward(params, tokens, segment_labels)
    jax.block_until_ready(sentence_rep)
    for s in inner_states:
        jax.block_until_ready(s)

    assert sentence_rep.shape == (B, 32)
    assert len(inner_states) == 1 + len(params["layers"])
    assert all(bool(jnp.isfinite(s.astype(jnp.float32)).all()) for s in inner_states)
    assert bool(jnp.isfinite(sentence_rep.astype(jnp.float32)).all())
    # TODO(synk): training-mode dropout (dropout/attention_dropout/activation_dropout) not modeled; eval semantics only.
    print("KERNEL_OK")
</pallas_src>

<mosaic_0001>
module attributes {stable_mosaic.version = 11 : i64} {
  func.func @fused_encoder_kernel(%arg0: i32, %arg1: i32, %arg2: memref<1x16x32xf32, #tpu.memory_space<vmem>>, %arg3: memref<4x8x8xbf16, #tpu.memory_space<vmem>>, %arg4: memref<1x2x8xf32, #tpu.memory_space<vmem>>, %arg5: memref<1x32x96xbf16, #tpu.memory_space<vmem>>, %arg6: memref<1x1x96xf32, #tpu.memory_space<vmem>>, %arg7: memref<1x32x32xbf16, #tpu.memory_space<vmem>>, %arg8: memref<1x1x32xf32, #tpu.memory_space<vmem>>, %arg9: memref<1x1x32xf32, #tpu.memory_space<vmem>>, %arg10: memref<1x1x32xf32, #tpu.memory_space<vmem>>, %arg11: memref<1x32x64xbf16, #tpu.memory_space<vmem>>, %arg12: memref<1x1x64xf32, #tpu.memory_space<vmem>>, %arg13: memref<1x64x32xbf16, #tpu.memory_space<vmem>>, %arg14: memref<1x1x32xf32, #tpu.memory_space<vmem>>, %arg15: memref<1x1x32xf32, #tpu.memory_space<vmem>>, %arg16: memref<1x1x32xf32, #tpu.memory_space<vmem>>, %arg17: memref<1x1x16x32xbf16, #tpu.memory_space<vmem>>, %arg18: memref<16x32xf32, #tpu.memory_space<vmem>>) attributes {dimension_semantics = [#tpu.dimension_semantics<parallel>, #tpu.dimension_semantics<arbitrary>], iteration_bounds = array<i64: 1, 2>, scalar_prefetch = 0 : i64, scratch_operands = 1 : i64, tpu.core_type = #tpu.core_type<tc>, window_params = [{transform_indices = @transform_0, window_bounds = array<i64: 1, 16, 32>}, {pipeline_mode = #tpu.pipeline_mode<synchronous>, transform_indices = @transform_1, window_bounds = array<i64: 4, 8, 8>}, {transform_indices = @transform_2, window_bounds = array<i64: 1, 2, 8>}, {transform_indices = @transform_3, window_bounds = array<i64: 1, 32, 96>}, {transform_indices = @transform_4, window_bounds = array<i64: 1, 1, 96>}, {transform_indices = @transform_5, window_bounds = array<i64: 1, 32, 32>}, {transform_indices = @transform_6, window_bounds = array<i64: 1, 1, 32>}, {transform_indices = @transform_7, window_bounds = array<i64: 1, 1, 32>}, {transform_indices = @transform_8, window_bounds = array<i64: 1, 1, 32>}, {transform_indices = @transform_9, window_bounds = array<i64: 1, 32, 64>}, {transform_indices = @transform_10, window_bounds = array<i64: 1, 1, 64>}, {transform_indices = @transform_11, window_bounds = array<i64: 1, 64, 32>}, {transform_indices = @transform_12, window_bounds = array<i64: 1, 1, 32>}, {transform_indices = @transform_13, window_bounds = array<i64: 1, 1, 32>}, {transform_indices = @transform_14, window_bounds = array<i64: 1, 1, 32>}, {transform_indices = @transform_15, window_bounds = array<i64: 1, 1, 16, 32>}]} {
    %c0_i32 = arith.constant 0 : i32
    %0 = arith.cmpi eq, %arg1, %c0_i32 : i32
    %1 = arith.extui %0 : i1 to i32
    %c0_i32_0 = arith.constant 0 : i32
    %2 = arith.cmpi ne, %1, %c0_i32_0 : i32
    scf.if %2 {
      %c0_68 = arith.constant 0 : index
      %c0_69 = arith.constant 0 : index
      %c0_70 = arith.constant 0 : index
      %162 = vector.load %arg2[%c0_68, %c0_69, %c0_70] : memref<1x16x32xf32, #tpu.memory_space<vmem>>, vector<1x16x32xf32>
      %163 = vector.shape_cast %162 : vector<1x16x32xf32> to vector<16x32xf32>
      %c0_71 = arith.constant 0 : index
      %c0_72 = arith.constant 0 : index
      %164 = vector.load %arg18[%c0_71, %c0_72] : memref<16x32xf32, #tpu.memory_space<vmem>>, vector<16x32xf32>
      tpu.vector_store %arg18[%c0_71, %c0_72], %163 {strides = array<i32>} : memref<16x32xf32, #tpu.memory_space<vmem>>, vector<16x32xf32>,
    } else {
    }
    %c0 = arith.constant 0 : index
    %c0_1 = arith.constant 0 : index
    %3 = vector.load %arg18[%c0, %c0_1] : memref<16x32xf32, #tpu.memory_space<vmem>>, vector<16x32xf32>
    %4 = arith.truncf %3 : vector<16x32xf32> to vector<16x32xbf16>
    %c0_2 = arith.constant 0 : index
    %c0_3 = arith.constant 0 : index
    %c0_4 = arith.constant 0 : index
    %5 = vector.load %arg5[%c0_2, %c0_3, %c0_4] : memref<1x32x96xbf16, #tpu.memory_space<vmem>>, vector<1x32x96xbf16>
    %6 = vector.shape_cast %5 : vector<1x32x96xbf16> to vector<32x96xbf16>
    %cst = arith.constant dense<0.000000e+00> : vector<16x96xf32>
    %7 = tpu.matmul %4, %6, %cst {dimension_numbers = #tpu.dot_dimension_numbers<[1], [0], [0], [1], [0, 0, 1, 1], [], []>} : vector<16x32xbf16>, vector<32x96xbf16>, vector<16x96xf32> -> vector<16x96xf32>
    %c0_5 = arith.constant 0 : index
    %c0_6 = arith.constant 0 : index
    %c0_7 = arith.constant 0 : index
    %8 = vector.load %arg6[%c0_5, %c0_6, %c0_7] : memref<1x1x96xf32, #tpu.memory_space<vmem>>, vector<1x1x96xf32>
    %9 = vector.shape_cast %8 : vector<1x1x96xf32> to vector<1x96xf32>
    %10 = vector.broadcast %9 : vector<1x96xf32> to vector<16x96xf32>
    %11 = arith.addf %7, %10 : vector<16x96xf32>
    %12 = vector.extract_strided_slice %11 {offsets = [0, 0], sizes = [16, 8], strides = [1, 1]} : vector<16x96xf32> to vector<16x8xf32>
    %13 = vector.shape_cast %12 : vector<16x8xf32> to vector<2x8x8xf32>
    %14 = vector.extract_strided_slice %11 {offsets = [0, 8], sizes = [16, 8], strides = [1, 1]} : vector<16x96xf32> to vector<16x8xf32>
    %15 = vector.shape_cast %14 : vector<16x8xf32> to vector<2x8x8xf32>
    %16 = vector.extract_strided_slice %11 {offsets = [0, 16], sizes = [16, 8], strides = [1, 1]} : vector<16x96xf32> to vector<16x8xf32>
    %17 = vector.shape_cast %16 : vector<16x8xf32> to vector<2x8x8xf32>
    %18 = vector.extract_strided_slice %11 {offsets = [0, 24], sizes = [16, 8], strides = [1, 1]} : vector<16x96xf32> to vector<16x8xf32>
    %19 = vector.shape_cast %18 : vector<16x8xf32> to vector<2x8x8xf32>
    %20 = tpu.concatenate %13, %15, %17, %19 in 0 : vector<2x8x8xf32>, vector<2x8x8xf32>, vector<2x8x8xf32>, vector<2x8x8xf32> -> vector<8x8x8xf32>
    %21 = arith.truncf %20 : vector<8x8x8xf32> to vector<8x8x8xbf16>
    %22 = vector.extract_strided_slice %11 {offsets = [0, 32], sizes = [16, 8], strides = [1, 1]} : vector<16x96xf32> to vector<16x8xf32>
    %23 = vector.shape_cast %22 : vector<16x8xf32> to vector<2x8x8xf32>
    %24 = vector.extract_strided_slice %11 {offsets = [0, 40], sizes = [16, 8], strides = [1, 1]} : vector<16x96xf32> to vector<16x8xf32>
    %25 = vector.shape_cast %24 : vector<16x8xf32> to vector<2x8x8xf32>
    %26 = vector.extract_strided_slice %11 {offsets = [0, 48], sizes = [16, 8], strides = [1, 1]} : vector<16x96xf32> to vector<16x8xf32>
    %27 = vector.shape_cast %26 : vector<16x8xf32> to vector<2x8x8xf32>
    %28 = vector.extract_strided_slice %11 {offsets = [0, 56], sizes = [16, 8], strides = [1, 1]} : vector<16x96xf32> to vector<16x8xf32>
    %29 = vector.shape_cast %28 : vector<16x8xf32> to vector<2x8x8xf32>
    %30 = tpu.concatenate %23, %25, %27, %29 in 0 : vector<2x8x8xf32>, vector<2x8x8xf32>, vector<2x8x8xf32>, vector<2x8x8xf32> -> vector<8x8x8xf32>
    %31 = arith.truncf %30 : vector<8x8x8xf32> to vector<8x8x8xbf16>
    %32 = vector.extract_strided_slice %11 {offsets = [0, 64], sizes = [16, 8], strides = [1, 1]} : vector<16x96xf32> to vector<16x8xf32>
    %33 = vector.shape_cast %32 : vector<16x8xf32> to vector<2x8x8xf32>
    %34 = vector.extract_strided_slice %11 {offsets = [0, 72], sizes = [16, 8], strides = [1, 1]} : vector<16x96xf32> to vector<16x8xf32>
    %35 = vector.shape_cast %34 : vector<16x8xf32> to vector<2x8x8xf32>
    %36 = vector.extract_strided_slice %11 {offsets = [0, 80], sizes = [16, 8], strides = [1, 1]} : vector<16x96xf32> to vector<16x8xf32>
    %37 = vector.shape_cast %36 : vector<16x8xf32> to vector<2x8x8xf32>
    %38 = vector.extract_strided_slice %11 {offsets = [0, 88], sizes = [16, 8], strides = [1, 1]} : vector<16x96xf32> to vector<16x8xf32>
    %39 = vector.shape_cast %38 : vector<16x8xf32> to vector<2x8x8xf32>
    %40 = tpu.concatenate %33, %35, %37, %39 in 0 : vector<2x8x8xf32>, vector<2x8x8xf32>, vector<2x8x8xf32>, vector<2x8x8xf32> -> vector<8x8x8xf32>
    %41 = arith.truncf %40 : vector<8x8x8xf32> to vector<8x8x8xbf16>
    "tpu.trace_start"() <{level = 10 : i32, message = "gqd,gkd->gqk"}> : () -> ()
    %cst_8 = arith.constant dense<0.000000e+00> : vector<8x8x8xf32>
    %42 = tpu.matmul %21, %31, %cst_8 {dimension_numbers = #tpu.dot_dimension_numbers<[2], [2], [1], [1], [0, 0, 0, 1, 1, 1], [0], [0]>} : vector<8x8x8xbf16>, vector<8x8x8xbf16>, vector<8x8x8xf32> -> vector<8x8x8xf32>
    "tpu.trace_stop"() : () -> ()
    %43 = vector.shape_cast %42 : vector<8x8x8xf32> to vector<4x2x8x8xf32>
    %c0_9 = arith.constant 0 : index
    %c0_10 = arith.constant 0 : index
    %c0_11 = arith.constant 0 : index
    %44 = vector.load %arg3[%c0_9, %c0_10, %c0_11] : memref<4x8x8xbf16, #tpu.memory_space<vmem>>, vector<4x8x8xbf16>
    %45 = arith.extf %44 : vector<4x8x8xbf16> to vector<4x8x8xf32>
    %46 = vector.shape_cast %45 : vector<4x8x8xf32> to vector<4x1x8x8xf32>
    %47 = vector.broadcast %46 : vector<4x1x8x8xf32> to vector<4x2x8x8xf32>
    %48 = arith.addf %43, %47 : vector<4x2x8x8xf32>
    %c0_12 = arith.constant 0 : index
    %c0_13 = arith.constant 0 : index
    %c0_14 = arith.constant 0 : index
    %49 = vector.load %arg4[%c0_12, %c0_13, %c0_14] : memref<1x2x8xf32, #tpu.memory_space<vmem>>, vector<1x2x8xf32>
    %50 = vector.shape_cast %49 : vector<1x2x8xf32> to vector<2x8xf32>
    %51 = vector.shape_cast %50 : vector<2x8xf32> to vector<1x2x1x8xf32>
    %52 = vector.broadcast %51 : vector<1x2x1x8xf32> to vector<4x2x8x8xf32>
    %53 = arith.addf %48, %52 : vector<4x2x8x8xf32>
    %54 = vector.shape_cast %53 : vector<4x2x8x8xf32> to vector<8x8x8xf32>
    %cst_15 = arith.constant dense<0xFF800000> : vector<8x8xf32>
    %55 = vector.multi_reduction <maximumf>, %54, %cst_15 [2] : vector<8x8x8xf32> to vector<8x8xf32>
    %56 = vector.shape_cast %55 : vector<8x8xf32> to vector<8x8x1xf32>
    %57 = vector.broadcast %56 : vector<8x8x1xf32> to vector<8x8x8xf32>
    %58 = arith.subf %54, %57 : vector<8x8x8xf32>
    %59 = math.exp %58 : vector<8x8x8xf32>
    %cst_16 = arith.constant dense<0.000000e+00> : vector<8x8xf32>
    %60 = vector.multi_reduction <add>, %59, %cst_16 [2] : vector<8x8x8xf32> to vector<8x8xf32>
    %61 = vector.shape_cast %60 : vector<8x8xf32> to vector<8x8x1xf32>
    %62 = arith.truncf %59 : vector<8x8x8xf32> to vector<8x8x8xbf16>
    "tpu.trace_start"() <{level = 10 : i32, message = "gqk,gkd->gqd"}> : () -> ()
    %cst_17 = arith.constant dense<0.000000e+00> : vector<8x8x8xf32>
    %63 = tpu.matmul %62, %41, %cst_17 {dimension_numbers = #tpu.dot_dimension_numbers<[2], [1], [1], [2], [0, 0, 0, 1, 1, 2], [0], [0]>} : vector<8x8x8xbf16>, vector<8x8x8xbf16>, vector<8x8x8xf32> -> vector<8x8x8xf32>
    "tpu.trace_stop"() : () -> ()
    %64 = tpu.reciprocal %61 {approx = true} : vector<8x8x1xf32> -> vector<8x8x1xf32>
    %65 = vector.broadcast %64 : vector<8x8x1xf32> to vector<8x8x8xf32>
    %66 = arith.mulf %63, %65 : vector<8x8x8xf32>
    %67 = vector.shape_cast %66 : vector<8x8x8xf32> to vector<4x16x8xf32>
    %68 = vector.extract_strided_slice %67 {offsets = [0, 0, 0], sizes = [1, 16, 8], strides = [1, 1, 1]} : vector<4x16x8xf32> to vector<1x16x8xf32>
    %69 = vector.shape_cast %68 : vector<1x16x8xf32> to vector<16x8xf32>
    %70 = vector.extract_strided_slice %67 {offsets = [1, 0, 0], sizes = [1, 16, 8], strides = [1, 1, 1]} : vector<4x16x8xf32> to vector<1x16x8xf32>
    %71 = vector.shape_cast %70 : vector<1x16x8xf32> to vector<16x8xf32>
    %72 = vector.extract_strided_slice %67 {offsets = [2, 0, 0], sizes = [1, 16, 8], strides = [1, 1, 1]} : vector<4x16x8xf32> to vector<1x16x8xf32>
    %73 = vector.shape_cast %72 : vector<1x16x8xf32> to vector<16x8xf32>
    %74 = vector.extract_strided_slice %67 {offsets = [3, 0, 0], sizes = [1, 16, 8], strides = [1, 1, 1]} : vector<4x16x8xf32> to vector<1x16x8xf32>
    %75 = vector.shape_cast %74 : vector<1x16x8xf32> to vector<16x8xf32>
    %76 = tpu.concatenate %69, %71, %73, %75 in 1 : vector<16x8xf32>, vector<16x8xf32>, vector<16x8xf32>, vector<16x8xf32> -> vector<16x32xf32>
    %77 = arith.truncf %76 : vector<16x32xf32> to vector<16x32xbf16>
    %c0_18 = arith.constant 0 : index
    %c0_19 = arith.constant 0 : index
    %c0_20 = arith.constant 0 : index
    %78 = vector.load %arg7[%c0_18, %c0_19, %c0_20] : memref<1x32x32xbf16, #tpu.memory_space<vmem>>, vector<1x32x32xbf16>
    %79 = vector.shape_cast %78 : vector<1x32x32xbf16> to vector<32x32xbf16>
    %cst_21 = arith.constant dense<0.000000e+00> : vector<16x32xf32>
    %80 = tpu.matmul %77, %79, %cst_21 {dimension_numbers = #tpu.dot_dimension_numbers<[1], [0], [0], [1], [0, 0, 1, 1], [], []>} : vector<16x32xbf16>, vector<32x32xbf16>, vector<16x32xf32> -> vector<16x32xf32>
    %c0_22 = arith.constant 0 : index
    %c0_23 = arith.constant 0 : index
    %c0_24 = arith.constant 0 : index
    %81 = vector.load %arg8[%c0_22, %c0_23, %c0_24] : memref<1x1x32xf32, #tpu.memory_space<vmem>>, vector<1x1x32xf32>
    %82 = vector.shape_cast %81 : vector<1x1x32xf32> to vector<1x32xf32>
    %83 = vector.broadcast %82 : vector<1x32xf32> to vector<16x32xf32>
    %84 = arith.addf %80, %83 : vector<16x32xf32>
    %85 = arith.addf %3, %84 : vector<16x32xf32>
    %c0_25 = arith.constant 0 : index
    %c0_26 = arith.constant 0 : index
    %c0_27 = arith.constant 0 : index
    %86 = vector.load %arg9[%c0_25, %c0_26, %c0_27] : memref<1x1x32xf32, #tpu.memory_space<vmem>>, vector<1x1x32xf32>
    %87 = vector.shape_cast %86 : vector<1x1x32xf32> to vector<1x32xf32>
    %c0_28 = arith.constant 0 : index
    %c0_29 = arith.constant 0 : index
    %c0_30 = arith.constant 0 : index
    %88 = vector.load %arg10[%c0_28, %c0_29, %c0_30] : memref<1x1x32xf32, #tpu.memory_space<vmem>>, vector<1x1x32xf32>
    %89 = vector.shape_cast %88 : vector<1x1x32xf32> to vector<1x32xf32>
    %cst_31 = arith.constant dense<0.000000e+00> : vector<16xf32>
    %90 = vector.multi_reduction <add>, %85, %cst_31 [1] : vector<16x32xf32> to vector<16xf32>
    %91 = vector.shape_cast %90 : vector<16xf32> to vector<16x1xf32>
    %cst_32 = arith.constant 3.200000e+01 : f32
    %92 = vector.broadcast %cst_32 : f32 to vector<16x1xf32>
    %93 = arith.divf %91, %92 : vector<16x1xf32>
    %94 = vector.broadcast %93 : vector<16x1xf32> to vector<16x32xf32>
    %95 = arith.subf %85, %94 : vector<16x32xf32>
    %96 = arith.mulf %95, %95 : vector<16x32xf32>
    %cst_33 = arith.constant dense<0.000000e+00> : vector<16xf32>
    %97 = vector.multi_reduction <add>, %96, %cst_33 [1] : vector<16x32xf32> to vector<16xf32>
    %98 = vector.shape_cast %97 : vector<16xf32> to vector<16x1xf32>
    %cst_34 = arith.constant 3.200000e+01 : f32
    %99 = vector.broadcast %cst_34 : f32 to vector<16x1xf32>
    %100 = arith.divf %98, %99 : vector<16x1xf32>
    %101 = vector.broadcast %93 : vector<16x1xf32> to vector<16x32xf32>
    %102 = arith.subf %85, %101 : vector<16x32xf32>
    %cst_35 = arith.constant 9.99999974E-6 : f32
    %103 = vector.broadcast %cst_35 : f32 to vector<16x1xf32>
    %104 = arith.addf %100, %103 : vector<16x1xf32>
    %105 = math.rsqrt %104 : vector<16x1xf32>
    %106 = vector.broadcast %105 : vector<16x1xf32> to vector<16x32xf32>
    %107 = arith.mulf %102, %106 : vector<16x32xf32>
    %108 = vector.broadcast %87 : vector<1x32xf32> to vector<16x32xf32>
    %109 = arith.mulf %107, %108 : vector<16x32xf32>
    %110 = vector.broadcast %89 : vector<1x32xf32> to vector<16x32xf32>
    %111 = arith.addf %109, %110 : vector<16x32xf32>
    %112 = arith.truncf %111 : vector<16x32xf32> to vector<16x32xbf16>
    %c0_36 = arith.constant 0 : index
    %c0_37 = arith.constant 0 : index
    %c0_38 = arith.constant 0 : index
    %113 = vector.load %arg11[%c0_36, %c0_37, %c0_38] : memref<1x32x64xbf16, #tpu.memory_space<vmem>>, vector<1x32x64xbf16>
    %114 = vector.shape_cast %113 : vector<1x32x64xbf16> to vector<32x64xbf16>
    %cst_39 = arith.constant dense<0.000000e+00> : vector<16x64xf32>
    %115 = tpu.matmul %112, %114, %cst_39 {dimension_numbers = #tpu.dot_dimension_numbers<[1], [0], [0], [1], [0, 0, 1, 1], [], []>} : vector<16x32xbf16>, vector<32x64xbf16>, vector<16x64xf32> -> vector<16x64xf32>
    %c0_40 = arith.constant 0 : index
    %c0_41 = arith.constant 0 : index
    %c0_42 = arith.constant 0 : index
    %116 = vector.load %arg12[%c0_40, %c0_41, %c0_42] : memref<1x1x64xf32, #tpu.memory_space<vmem>>, vector<1x1x64xf32>
    %117 = vector.shape_cast %116 : vector<1x1x64xf32> to vector<1x64xf32>
    %118 = vector.broadcast %117 : vector<1x64xf32> to vector<16x64xf32>
    %119 = arith.addf %115, %118 : vector<16x64xf32>
    %cst_43 = arith.constant 0.000000e+00 : f32
    %120 = vector.broadcast %cst_43 : f32 to vector<16x64xf32>
    %121 = arith.maximumf %119, %120 : vector<16x64xf32>
    %122 = arith.truncf %121 : vector<16x64xf32> to vector<16x64xbf16>
    %c0_44 = arith.constant 0 : index
    %c0_45 = arith.constant 0 : index
    %c0_46 = arith.constant 0 : index
    %123 = vector.load %arg13[%c0_44, %c0_45, %c0_46] : memref<1x64x32xbf16, #tpu.memory_space<vmem>>, vector<1x64x32xbf16>
    %124 = vector.shape_cast %123 : vector<1x64x32xbf16> to vector<64x32xbf16>
    %cst_47 = arith.constant dense<0.000000e+00> : vector<16x32xf32>
    %125 = tpu.matmul %122, %124, %cst_47 {dimension_numbers = #tpu.dot_dimension_numbers<[1], [0], [0], [1], [0, 0, 1, 1], [], []>} : vector<16x64xbf16>, vector<64x32xbf16>, vector<16x32xf32> -> vector<16x32xf32>
    %c0_48 = arith.constant 0 : index
    %c0_49 = arith.constant 0 : index
    %c0_50 = arith.constant 0 : index
    %126 = vector.load %arg14[%c0_48, %c0_49, %c0_50] : memref<1x1x32xf32, #tpu.memory_space<vmem>>, vector<1x1x32xf32>
    %127 = vector.shape_cast %126 : vector<1x1x32xf32> to vector<1x32xf32>
    %128 = vector.broadcast %127 : vector<1x32xf32> to vector<16x32xf32>
    %129 = arith.addf %125, %128 : vector<16x32xf32>
    %130 = arith.addf %111, %129 : vector<16x32xf32>
    %c0_51 = arith.constant 0 : index
    %c0_52 = arith.constant 0 : index
    %c0_53 = arith.constant 0 : index
    %131 = vector.load %arg15[%c0_51, %c0_52, %c0_53] : memref<1x1x32xf32, #tpu.memory_space<vmem>>, vector<1x1x32xf32>
    %132 = vector.shape_cast %131 : vector<1x1x32xf32> to vector<1x32xf32>
    %c0_54 = arith.constant 0 : index
    %c0_55 = arith.constant 0 : index
    %c0_56 = arith.constant 0 : index
    %133 = vector.load %arg16[%c0_54, %c0_55, %c0_56] : memref<1x1x32xf32, #tpu.memory_space<vmem>>, vector<1x1x32xf32>
    %134 = vector.shape_cast %133 : vector<1x1x32xf32> to vector<1x32xf32>
    %cst_57 = arith.constant dense<0.000000e+00> : vector<16xf32>
    %135 = vector.multi_reduction <add>, %130, %cst_57 [1] : vector<16x32xf32> to vector<16xf32>
    %136 = vector.shape_cast %135 : vector<16xf32> to vector<16x1xf32>
    %cst_58 = arith.constant 3.200000e+01 : f32
    %137 = vector.broadcast %cst_58 : f32 to vector<16x1xf32>
    %138 = arith.divf %136, %137 : vector<16x1xf32>
    %139 = vector.broadcast %138 : vector<16x1xf32> to vector<16x32xf32>
    %140 = arith.subf %130, %139 : vector<16x32xf32>
    %141 = arith.mulf %140, %140 : vector<16x32xf32>
    %cst_59 = arith.constant dense<0.000000e+00> : vector<16xf32>
    %142 = vector.multi_reduction <add>, %141, %cst_59 [1] : vector<16x32xf32> to vector<16xf32>
    %143 = vector.shape_cast %142 : vector<16xf32> to vector<16x1xf32>
    %cst_60 = arith.constant 3.200000e+01 : f32
    %144 = vector.broadcast %cst_60 : f32 to vector<16x1xf32>
    %145 = arith.divf %143, %144 : vector<16x1xf32>
    %146 = vector.broadcast %138 : vector<16x1xf32> to vector<16x32xf32>
    %147 = arith.subf %130, %146 : vector<16x32xf32>
    %cst_61 = arith.constant 9.99999974E-6 : f32
    %148 = vector.broadcast %cst_61 : f32 to vector<16x1xf32>
    %149 = arith.addf %145, %148 : vector<16x1xf32>
    %150 = math.rsqrt %149 : vector<16x1xf32>
    %151 = vector.broadcast %150 : vector<16x1xf32> to vector<16x32xf32>
    %152 = arith.mulf %147, %151 : vector<16x32xf32>
    %153 = vector.broadcast %132 : vector<1x32xf32> to vector<16x32xf32>
    %154 = arith.mulf %152, %153 : vector<16x32xf32>
    %155 = vector.broadcast %134 : vector<1x32xf32> to vector<16x32xf32>
    %156 = arith.addf %154, %155 : vector<16x32xf32>
    %c0_62 = arith.constant 0 : index
    %c0_63 = arith.constant 0 : index
    %157 = vector.load %arg18[%c0_62, %c0_63] : memref<16x32xf32, #tpu.memory_space<vmem>>, vector<16x32xf32>
    tpu.vector_store %arg18[%c0_62, %c0_63], %156 {strides = array<i32>} : memref<16x32xf32, #tpu.memory_space<vmem>>, vector<16x32xf32>,
    %158 = arith.truncf %156 : vector<16x32xf32> to vector<16x32xbf16>
    %c0_64 = arith.constant 0 : index
    %c0_65 = arith.constant 0 : index
    %c0_66 = arith.constant 0 : index
    %c0_67 = arith.constant 0 : index
    %159 = vector.load %arg17[%c0_64, %c0_65, %c0_66, %c0_67] : memref<1x1x16x32xbf16, #tpu.memory_space<vmem>>, vector<1x1x16x32xbf16>
    %160 = vector.shape_cast %159 : vector<1x1x16x32xbf16> to vector<16x32xbf16>
    %161 = vector.shape_cast %158 : vector<16x32xbf16> to vector<1x1x16x32xbf16>
    tpu.vector_store %arg17[%c0_64, %c0_65, %c0_66, %c0_67], %161 {strides = array<i32>} : memref<1x1x16x32xbf16, #tpu.memory_space<vmem>>, vector<1x1x16x32xbf16>,
    return
  }
  func.func @transform_0(%arg0: i32, %arg1: i32) -> (i32, i32, i32) {
    %c0_i32 = arith.constant 0 : i32
    %c0_i32_0 = arith.constant 0 : i32
    %c0_i32_1 = arith.constant 0 : i32
    return %arg0, %c0_i32, %c0_i32_0 : i32, i32, i32
  }
  func.func @transform_1(%arg0: i32, %arg1: i32) -> (i32, i32, i32) {
    %c0_i32 = arith.constant 0 : i32
    %c0_i32_0 = arith.constant 0 : i32
    %c0_i32_1 = arith.constant 0 : i32
    %c0_i32_2 = arith.constant 0 : i32
    return %c0_i32, %c0_i32_0, %c0_i32_1 : i32, i32, i32
  }
  func.func @transform_2(%arg0: i32, %arg1: i32) -> (i32, i32, i32) {
    %c0_i32 = arith.constant 0 : i32
    %c0_i32_0 = arith.constant 0 : i32
    %c0_i32_1 = arith.constant 0 : i32
    return %arg0, %c0_i32, %c0_i32_0 : i32, i32, i32
  }
  func.func @transform_3(%arg0: i32, %arg1: i32) -> (i32, i32, i32) {
    %c0_i32 = arith.constant 0 : i32
    %c0_i32_0 = arith.constant 0 : i32
    %c0_i32_1 = arith.constant 0 : i32
    return %arg1, %c0_i32, %c0_i32_0 : i32, i32, i32
  }
  func.func @transform_4(%arg0: i32, %arg1: i32) -> (i32, i32, i32) {
    %c0_i32 = arith.constant 0 : i32
    %c0_i32_0 = arith.constant 0 : i32
    %c0_i32_1 = arith.constant 0 : i32
    return %arg1, %c0_i32, %c0_i32_0 : i32, i32, i32
  }
  func.func @transform_5(%arg0: i32, %arg1: i32) -> (i32, i32, i32) {
    %c0_i32 = arith.constant 0 : i32
    %c0_i32_0 = arith.constant 0 : i32
    %c0_i32_1 = arith.constant 0 : i32
    return %arg1, %c0_i32, %c0_i32_0 : i32, i32, i32
  }
  func.func @transform_6(%arg0: i32, %arg1: i32) -> (i32, i32, i32) {
    %c0_i32 = arith.constant 0 : i32
    %c0_i32_0 = arith.constant 0 : i32
    %c0_i32_1 = arith.constant 0 : i32
    return %arg1, %c0_i32, %c0_i32_0 : i32, i32, i32
  }
  func.func @transform_7(%arg0: i32, %arg1: i32) -> (i32, i32, i32) {
    %c0_i32 = arith.constant 0 : i32
    %c0_i32_0 = arith.constant 0 : i32
    %c0_i32_1 = arith.constant 0 : i32
    return %arg1, %c0_i32, %c0_i32_0 : i32, i32, i32
  }
  func.func @transform_8(%arg0: i32, %arg1: i32) -> (i32, i32, i32) {
    %c0_i32 = arith.constant 0 : i32
    %c0_i32_0 = arith.constant 0 : i32
    %c0_i32_1 = arith.constant 0 : i32
    return %arg1, %c0_i32, %c0_i32_0 : i32, i32, i32
  }
  func.func @transform_9(%arg0: i32, %arg1: i32) -> (i32, i32, i32) {
    %c0_i32 = arith.constant 0 : i32
    %c0_i32_0 = arith.constant 0 : i32
    %c0_i32_1 = arith.constant 0 : i32
    return %arg1, %c0_i32, %c0_i32_0 : i32, i32, i32
  }
  func.func @transform_10(%arg0: i32, %arg1: i32) -> (i32, i32, i32) {
    %c0_i32 = arith.constant 0 : i32
    %c0_i32_0 = arith.constant 0 : i32
    %c0_i32_1 = arith.constant 0 : i32
    return %arg1, %c0_i32, %c0_i32_0 : i32, i32, i32
  }
  func.func @transform_11(%arg0: i32, %arg1: i32) -> (i32, i32, i32) {
    %c0_i32 = arith.constant 0 : i32
    %c0_i32_0 = arith.constant 0 : i32
    %c0_i32_1 = arith.constant 0 : i32
    return %arg1, %c0_i32, %c0_i32_0 : i32, i32, i32
  }
  func.func @transform_12(%arg0: i32, %arg1: i32) -> (i32, i32, i32) {
    %c0_i32 = arith.constant 0 : i32
    %c0_i32_0 = arith.constant 0 : i32
    %c0_i32_1 = arith.constant 0 : i32
    return %arg1, %c0_i32, %c0_i32_0 : i32, i32, i32
  }
  func.func @transform_13(%arg0: i32, %arg1: i32) -> (i32, i32, i32) {
    %c0_i32 = arith.constant 0 : i32
    %c0_i32_0 = arith.constant 0 : i32
    %c0_i32_1 = arith.constant 0 : i32
    return %arg1, %c0_i32, %c0_i32_0 : i32, i32, i32
  }
  func.func @transform_14(%arg0: i32, %arg1: i32) -> (i32, i32, i32) {
    %c0_i32 = arith.constant 0 : i32
    %c0_i32_0 = arith.constant 0 : i32
    %c0_i32_1 = arith.constant 0 : i32
    return %arg1, %c0_i32, %c0_i32_0 : i32, i32, i32
  }
  func.func @transform_15(%arg0: i32, %arg1: i32) -> (i32, i32, i32, i32) {
    %c0_i32 = arith.constant 0 : i32
    %c0_i32_0 = arith.constant 0 : i32
    %c0_i32_1 = arith.constant 0 : i32
    return %arg1, %arg0, %c0_i32, %c0_i32_0 : i32, i32, i32, i32
  }
}

</mosaic_0001>

<bundles_post_ra>
// kernel: tpu_custom_call.1
= control target key start
LH: loop header
LB: loop body
LE: loop exit
PB: predicated region body
PF: predicated region fallthrough
CT: control target
= control target key end

     0   :  { %s3769_s0 = inlined_call_operand.hbm [shape: f32[1,16,32], index: 0, kind: input, shape index: {}]   ;;  %s3770_s1 = inlined_call_operand.hbm [shape: bf16[4,8,8], index: 1, kind: input, shape index: {}]   ;;  %s3771_s2 = inlined_call_operand.vmem [shape: f32[1,2,8], index: 2, kind: input, shape index: {}]   ;;  %s3772_s3 = inlined_call_operand.vmem [shape: bf16[2,32,96], index: 3, kind: input, shape index: {}]   ;;  %s3773_s4 = inlined_call_operand.vmem [shape: f32[2,1,96], index: 4, kind: input, shape index: {}]   ;;  %s3774_s5 = inlined_call_operand.vmem [shape: bf16[2,32,32], index: 5, kind: input, shape index: {}]   ;;  %s3775_s6 = inlined_call_operand.vmem [shape: f32[2,1,32], index: 6, kind: input, shape index: {}]   ;;  %s3776_s7 = inlined_call_operand.vmem [shape: f32[2,1,32], index: 7, kind: input, shape index: {}]   ;;  %s3777_s8 = inlined_call_operand.hbm [shape: f32[2,1,32], index: 8, kind: input, shape index: {}]   ;;  %s3778_s9 = inlined_call_operand.vmem [shape: bf16[2,32,64], index: 9, kind: input, shape index: {}]   ;;  %s3779_s10 = inlined_call_operand.hbm [shape: f32[2,1,64], index: 10, kind: input, shape index: {}]   ;;  %s3780_s11 = inlined_call_operand.vmem [shape: bf16[2,64,32], index: 11, kind: input, shape index: {}]   ;;  %s3781_s12 = inlined_call_operand.vmem [shape: f32[2,1,32], index: 12, kind: input, shape index: {}]   ;;  %s3782_s13 = inlined_call_operand.vmem [shape: f32[2,1,32], index: 13, kind: input, shape index: {}]   ;;  %s3783_s14 = inlined_call_operand.vmem [shape: f32[2,1,32], index: 14, kind: input, shape index: {}]   ;;  %s3784_s15 = inlined_call_operand.hbm [shape: bf16[2,1,16,32], index: 15, kind: output, shape index: {}]  }
   0x1   :  { %3805 = sst [smem:[#allocation23_spill]] %s3769_s0 }
   0x2   :  { %3806 = sst [smem:[#allocation24_spill]] %s3770_s1 }
   0x3   :  { %3807 = sst [smem:[#allocation25_spill]] %s3771_s2 }
   0x4   :  { %3808 = sst [smem:[#allocation26_spill]] %s3772_s3 }
   0x5   :  { %3809 = sst [smem:[#allocation27_spill]] %s3774_s5 }
   0x6   :  { %3810 = sst [smem:[#allocation28_spill]] %s3777_s8 }
   0x7   :  { %3811 = sst [smem:[#allocation29_spill]] %s3779_s10 }
   0x8   :  { %3812 = sst [smem:[#allocation30_spill]] %s3780_s11 }
   0x9   :  { %3813 = sst [smem:[#allocation31_spill]] %s3781_s12 }
   0xa   :  { %3814 = sst [smem:[#allocation32_spill]] %s3782_s13 }
   0xb   :  { %3815 = sst [smem:[#allocation33_spill]] %s3783_s14 }
   0xc   :  { %3816 = sst [smem:[#allocation34_spill]] %s3784_s15 }
   0xd   :  { %20 = vsyncpa [#allocation4], 0 }
   0xe   :  { %21 = vsyncpa [#allocation7], 0 }
   0xf   :  { %22 = vsyncpa [#allocation5], 0 }
  0x10   :  { %24 = vsyncpa [#allocation5 + $0x1], 0  ;;  %s3177_s18 = smov 0   ;;  %s3179_s19 = smov 0  }
  0x11   :  { %s3181_s20 = smov 0   ;;  %s3183_s21 = smov 0  }
  0x12   :  { %s3185_s22 = smov 0   ;;  %s3187_s23 = smov 0  }
  0x13 LB: > { %3817 = sst [smem:[#allocation15_spill]] %s3054_s18  ;;  %s3208_s24 = sadd.s32 4294967295, %s3074_s23   ;;  %s3074_s23 = sphi %s3187_s23, %s30_s23   ;;  %s3070_s22 = sphi %s3185_s22, %s3875_s22   ;;  %s3066_s21 = sphi %s3183_s21, %s3874_s21   ;;  %s3062_s20 = sphi %s3181_s20, %s3873_s20   ;;  %s3058_s19 = sphi %s3179_s19, %s3877_s19   ;;  %s3054_s18 = sphi %s3177_s18, %s3876_s18  }
  0x14   : > { %3818 = sst [smem:[#allocation16_spill]] %s3062_s20  ;;  %s2423_s25 = sadd.s32 4294967294, %s3074_s23  }
  0x15   : > { %3819 = sst [smem:[#allocation17_spill]] %s3070_s22  ;;  %p265_p0 = scmp.ne.s32.totalorder %s3058_s19, %s3054_s18 }
  0x16   : > { %3820 = sst [smem:[#allocation18_spill]] %s3074_s23  ;;  %p3788_p1 = scmp.eq.s32.totalorder %s3208_s24, 0 }
  0x17   : > { %p453_p3 = scmp.eq.s32.totalorder %s2423_s25, 1  ;;  %p2424_p5 = scmp.ge.s32.totalorder %s3074_s23, 1 }
  0x18   : > { %p3217_p4 = por %p3788_p1, %p265_p0  ;;  %p460_p7 = scmp.lt.s32.totalorder %s3074_s23, 3 }
  0x19   : > { %p3222_p6 = por %p453_p3, %p265_p0  ;;  %s3076_s29 = smov [#allocation3]  }
  0x1a   : > { %s3821_s26 = scalar_select %p3217_p4, 1, 0 }
  0x1b   : > { %s3822_s27 = scalar_select %p3222_p6, 1, 0 }
  0x1c   : > { %p3227_p8 = pnand %p2424_p5, %p460_p7  ;;  %s475_s30 = sshll.u32 %s3076_s29, 4  ;;  %s476_s30 = int_to_ptr.vmem [resolvable:$true] %s475_s30 }
  0x1d   : > { %3823 = sst [smem:[#allocation19_spill]] %s3822_s27  ;;  %s39_s17 = sadd.s32 1, %s3070_s22 }
  0x1e   : > { %s3824_s28 = scalar_select %p3227_p8, 1, 0 }
  0x1f   : > { %p2698_p9 = pneg %p3227_p8  ;;  %s3826_s0 = sld [smem:[#allocation23_spill]] }
  0x21   : > { %p3236_p11 = pnand %p2698_p9, %p3788_p1 }
  0x23   : > { %p3796_p13 = pneg %p3236_p11 }
  0x25   : > { %s2868_s18 = scalar_lea.hbm %s3826_s0, 256 }
  0x26   : > { %p2869_p12 = scmp.ne.s32.totalorder %s3826_s0, %s2868_s18  ;;  %p2875_p5 = scmp.lt.u32.totalorder %s2868_s18, %s3826_s0 }
  0x28   : > { %p2871_p0 = pnand %p3796_p13, %p2869_p12 }
  0x2a   : > { %p2872_p3 = pneg %p2871_p0 }
  0x2c   : > { %p2877_p7 = pnand %p2875_p5, %p2872_p3 }
  0x2e   : > { %2880 = shalt.err (!%p2877_p7)
}
  0x2f   : > { %s2881_s13 = scalar_lea.vmem %s476_s30, 256  ;;  %p2889_p2 = scmp.lt.s32.totalorder %s476_s30, %s476_s30 }
  0x30   : > { %p2882_p9 = scmp.ne.s32.totalorder %s476_s30, %s2881_s13  ;;  %p2890_p6 = scmp.lt.s32.totalorder %s2881_s13, %s2881_s13 }
  0x32   : > { %p2884_p10 = pnand %p2882_p9, %p3796_p13  ;;  %p2891_p4 = por %p2890_p6, %p2889_p2 }
  0x34   : > { %p2885_p1 = pneg %p2884_p10 }
  0x36   : > { %p2892_p8 = pnand %p2891_p4, %p2885_p1 }
  0x38   : > { %2895 = shalt.err (!%p2892_p8)
}
  0x39   : > { %s3077_s2 = smov 128   ;;  %s3078_s14 = smov 8  }
  0x3a   : > { %2701 = dma.hbm_to_vmem [thread:$0]  (!%p3236_p11), %s3826_s0, 256, %s476_s30, [#allocation4], %s3077_s2, %s3077_s2, %s3078_s14  }
  0x3b   : > { %p40_p1 = scmp.ge.s32.totalorder %s39_s17, 2  ;;  %s252_s18 = sadd.s32 1, %s3062_s20 }
  0x3c   : > { %p259_p2 = scmp.ne.s32.totalorder %s3062_s20, %s3058_s19  ;;  %p260_p4 = scmp.eq.s32.totalorder %s3074_s23, 0 }
  0x3d   : > { %s3879_s17 = smov (%p40_p1, %s39_s17), 0  ;;  %p3829_p8 = scmp.eq.s32.totalorder %s3208_s24, 1 }
  0x3e   : > { %3827 = sst [smem:[#allocation20_spill]] %s3879_s17  ;;  %p3269_p6 = por %p260_p4, %p259_p2 }
  0x3f   : > { %p3275_p10 = por %p3829_p8, %p259_p2  ;;  %s249_s29 = ssub.s32 %s3070_s22, %s3879_s17 }
  0x40   : > { %p2718_p12 = scmp.lt.s32.totalorder %s3074_s23, 2  ;;  %p250_p0 = scmp.eq.s32.totalorder %s249_s29, 0 }
  0x41   : > { %s3830_s25 = scalar_select %p3275_p10, 1, 0 }
  0x42   : > { %s543_s30 = sand.u32 1, %s3074_s23   ;;  %s3793_s2 = sand.u32 1, %s3062_s20  }
  0x43   : > { %3831 = sst [smem:[#allocation21_spill]] %s3830_s25  ;;  %s3792_s15 = sshll.u32 %s3070_s22, 4 }
  0x44   : > { %s3285_s14 = scalar_select %p250_p0, %s3062_s20, %s252_s18  }
  0x45   : > { %s3833_s8 = sld [smem:[#allocation28_spill]]  ;;  %s546_s11 = scalar_lea.vmem [#allocation8], %s3793_s2 }
  0x46   : > { %3832 = sst [smem:[#allocation22_spill]] %s3285_s14  ;;  %s553_s17 = sshll.u32 %s546_s11, 4  ;;  %s3297_s17 = int_to_ptr.vmem [resolvable:$true] %s553_s17 }
  0x47   : > { %p3301_p3 = pnand %p2718_p12, %p3269_p6  ;;  %s3079_s29 = smov [#allocation6]  }
  0x48   : > { %s3305_s0 = sshll.u32 %s3079_s29, 4  ;;  %s3307_s13 = scalar_lea.sflag [#allocation4], %s543_s30  ;;  %s489_s0 = int_to_ptr.vmem [resolvable:$true] %s3305_s0 }
  0x49   : > { %s3834_s18 = scalar_select %p3301_p3, 1, 0 }
  0x4a   : > { %p3798_p7 = pneg %p3301_p3 }
  0x4b   : > { %s3293_s12 = scalar_lea.hbm %s3833_s8, %s3792_s15  ;;  %s2901_s2 = scalar_lea.hbm %s3833_s8, 32 }
  0x4c   : > { %s2896_s15 = scalar_lea.hbm %s3293_s12, 16  ;;  %p2902_p2 = scmp.lt.u32.totalorder %s3293_s12, %s3833_s8 }
  0x4d   : > { %p2897_p5 = scmp.ne.s32.totalorder %s3293_s12, %s2896_s15  ;;  %p2903_p4 = scmp.lt.u32.totalorder %s2901_s2, %s2896_s15 }
  0x4e   : > { %p2905_p8 = scmp.lt.u32.totalorder %s2896_s15, %s3293_s12 }
  0x4f   : > { %p2899_p9 = pnand %p3798_p7, %p2897_p5  ;;  %p2904_p6 = por %p2903_p4, %p2902_p2 }
  0x51   : > { %p2900_p1 = pneg %p2899_p9  ;;  %p2906_p12 = por %p2905_p8, %p2904_p6 }
  0x53   : > { %p2907_p0 = pnand %p2906_p12, %p2900_p1 }
  0x55   : > { %2910 = shalt.err (!%p2907_p0)
}
  0x56   : > { %s2911_s30 = scalar_lea.vmem %s3297_s17, 16  ;;  %s3080_s29 = smov [#allocation8]  }
  0x57   : > { %p2912_p5 = scmp.ne.s32.totalorder %s3297_s17, %s2911_s30  ;;  %s2916_s11 = sshll.u32 %s3080_s29, 4  ;;  %s2917_s11 = int_to_ptr.vmem [resolvable:$false] %s2916_s11 }
  0x58   : > { %s2918_s23 = scalar_lea.vmem %s2917_s11, 32  ;;  %p2919_p10 = scmp.lt.s32.totalorder %s3297_s17, %s2917_s11 }
  0x59   : > { %p2914_p9 = pnand %p2912_p5, %p3798_p7  ;;  %p2920_p2 = scmp.lt.s32.totalorder %s2918_s23, %s2911_s30 }
  0x5b   : > { %p2915_p13 = pneg %p2914_p9  ;;  %p2921_p4 = por %p2920_p2, %p2919_p10 }
  0x5d   : > { %p2922_p6 = pnand %p2921_p4, %p2915_p13 }
  0x5f   : > { %2925 = shalt.err (!%p2922_p6)
}
  0x60   : > { %2708 = dma.hbm_to_vmem [thread:$0]  (!%p3301_p3), %s3293_s12, 16, %s3297_s17, %s3307_s13  }
  0x61   : > { %s3835_s1 = sld [smem:[#allocation24_spill]]  ;;  %p3836_p13 = pneg %p3236_p11 }
  0x67   : > { %s2926_s15 = scalar_lea.hbm %s3835_s1, 256 }
  0x68   : > { %p2927_p1 = scmp.ne.s32.totalorder %s3835_s1, %s2926_s15  ;;  %p2933_p12 = scmp.lt.u32.totalorder %s2926_s15, %s3835_s1 }
  0x6a   : > { %p2929_p10 = pnand %p2927_p1, %p3836_p13 }
  0x6c   : > { %p2930_p8 = pneg %p2929_p10 }
  0x6e   : > { %p2935_p0 = pnand %p2933_p12, %p2930_p8 }
  0x70   : > { %2938 = shalt.err (!%p2935_p0)
}
  0x71   : > { %s2939_s12 = scalar_lea.vmem %s489_s0, 256  ;;  %p3837_p9 = pmov %p3836_p13 }
  0x72   : > { %p2940_p5 = scmp.ne.s32.totalorder %s489_s0, %s2939_s12  ;;  %p2947_p6 = scmp.lt.s32.totalorder %s489_s0, %s489_s0 }
  0x73   : > { %p2948_p7 = scmp.lt.s32.totalorder %s2939_s12, %s2939_s12 }
  0x74   : > { %p2942_p2 = pnand %p2940_p5, %p3837_p9 }
  0x75   : > { %p2949_p3 = por %p2948_p7, %p2947_p6 }
  0x76   : > { %p2943_p4 = pneg %p2942_p2 }
  0x78   : > { %p2950_p1 = pnand %p2949_p3, %p2943_p4 }
  0x7a   : > { %2953 = shalt.err (!%p2950_p1)
}
  0x7b   : > { %s3081_s17 = smov 64   ;;  %s3082_s23 = smov 4  }
  0x7c   : > { %2704 = dma.hbm_to_vmem [thread:$0]  (!%p3236_p11), %s3835_s1, 256, %s489_s0, [#allocation7], %s3081_s17, %s3081_s17, %s3082_s23  }
  0x7d   : > { %s3838_s15 = sshll.u32 %s3070_s22, 4  ;;  %s3839_s10 = sld [smem:[#allocation29_spill]] }
  0x7e   : > { %s3840_s11 = sand.u32 1, %s3062_s20   ;;  %p3841_p7 = scmp.ne.s32.totalorder %s3834_s18, 0 }
  0x7f   : > { %s571_s12 = scalar_lea.vmem [#allocation9], %s3840_s11 }
  0x80   : > { %s578_s8 = sshll.u32 %s571_s12, 4  ;;  %p3842_p13 = pneg %p3841_p7  ;;  %s579_s8 = int_to_ptr.vmem [resolvable:$true] %s578_s8 }
  0x83   : > { %s3361_s30 = scalar_lea.hbm %s3839_s10, %s3838_s15  ;;  %s2959_s17 = scalar_lea.hbm %s3839_s10, 32 }
  0x84   : > { %s2954_s25 = scalar_lea.hbm %s3361_s30, 16  ;;  %p2960_p8 = scmp.lt.u32.totalorder %s3361_s30, %s3839_s10 }
  0x85   : > { %p2955_p3 = scmp.ne.s32.totalorder %s3361_s30, %s2954_s25  ;;  %p2961_p12 = scmp.lt.u32.totalorder %s2959_s17, %s2954_s25 }
  0x86   : > { %p2963_p5 = scmp.lt.u32.totalorder %s2954_s25, %s3361_s30 }
  0x87   : > { %p2957_p10 = pnand %p2955_p3, %p3842_p13  ;;  %p2962_p0 = por %p2961_p12, %p2960_p8 }
  0x89   : > { %p2958_p11 = pneg %p2957_p10  ;;  %p2964_p9 = por %p2963_p5, %p2962_p0 }
  0x8b   : > { %p2965_p2 = pnand %p2964_p9, %p2958_p11 }
  0x8d   : > { %2968 = shalt.err (!%p2965_p2)
}
  0x8e   : > { %s2969_s14 = scalar_lea.vmem %s579_s8, 16  ;;  %p3843_p6 = pmov %p3842_p13 }
  0x8f   : > { %p2970_p4 = scmp.ne.s32.totalorder %s579_s8, %s2969_s14  ;;  %s3083_s15 = smov [#allocation9]  }
  0x90   : > { %s2974_s27 = sshll.u32 %s3083_s15, 4  ;;  %s2975_s27 = int_to_ptr.vmem [resolvable:$false] %s2974_s27 }
  0x91   : > { %p2972_p1 = pnand %p2970_p4, %p3843_p6  ;;  %s2976_s29 = scalar_lea.vmem %s2975_s27, 32 }
  0x92   : > { %p2977_p13 = scmp.lt.s32.totalorder %s579_s8, %s2975_s27  ;;  %p2978_p10 = scmp.lt.s32.totalorder %s2976_s29, %s2969_s14 }
  0x93   : > { %p2973_p3 = pneg %p2972_p1 }
  0x94   : > { %p2979_p8 = por %p2978_p10, %p2977_p13 }
  0x96   : > { %p2980_p12 = pnand %p2979_p8, %p2973_p3 }
  0x98   : > { %2983 = shalt.err (!%p2980_p12)
}
  0x99   : > { %2711 = dma.hbm_to_vmem [thread:$0]  (!%p3841_p7), %s3361_s30, 16, %s579_s8, %s3307_s13  }
  0x9a   : > { %p3844_p11 = scmp.ne.s32.totalorder %s3824_s28, 0 }
  0x9b   : > { %p3845_p0 = scmp.eq.s32.totalorder (!%p3844_p11), %s3208_s24, 0 }
  0x9c   : > { %613 = sbr.rel (%p3844_p11) target bundleno = 2733 (0xaad), region = 80 }
  0xa3   : > { %3037 = dma.done.wait (%p3845_p0), [#allocation4], 256   ;;  %p3846_p5 = pmov %p3845_p0 }
  0xa4   : > { %p3847_p9 = pmov %p3845_p0 }
  0xa5   : > { %3039 = vsyncadd (%p3846_p5), [#allocation4], 4294967040 }
  0xa6   : > { %3041 = dma.done.wait (%p3847_p9), [#allocation7], 256   ;;  %p3848_p2 = pmov %p3845_p0 }
  0xa7   : > { %s623_s25 = sand.u32 1, %s3208_s24   ;;  %s3397_s8 = sand.u32 1, %s3058_s19  }
  0xa8   : > { %3043 = vsyncadd (%p3848_p2), [#allocation7], 4294967040  ;;  %s624_s28 = scalar_lea.sflag [#allocation4], %s623_s25  ;;  %p3849_p7 = scmp.ne.s32.totalorder %s3821_s26, 0 }
  0xaa   : > { %3045 = dma.done.wait (%p3849_p7), %s624_s28, 32  }
  0xab   : > { %3047 = vsyncadd (%p3849_p7), %s624_s28, 4294967264  ;;  %s2434_s13 = sshll.u32 %s3397_s8, 3  ;;  %p730_p4 = scmp.lt.s32.totalorder %s3066_s21, 1 }
  0xac   : > { %s3850_s3 = sld [smem:[#allocation26_spill]]  ;;  %s3851_s5 = sld [smem:[#allocation27_spill]] }
  0xad   : > { %s3407_s30 = scalar_select %p730_p4, %s3066_s21, 1 }
  0xae   : > { %s3853_s10 = sld [smem:[#allocation31_spill]]  ;;  %s3854_s22 = sld [smem:[#allocation32_spill]] }
  0xaf   : > { %s2490_s24 = sshll.u32 %s3407_s30, 4  ;;  %s2493_s16 = sshll.u32 %s3407_s30, 5 }
  0xb0   : > { %s3433_s26 = scalar_lea.vmem %s3778_s9, %s2490_s24  ;;  %s3855_s20 = sld [smem:[#allocation33_spill]] }
  0xb1   : > { %s3454_s11 = scalar_lea.vmem [#allocation10], %s2434_s13  ;;  %p2443_p6 = scmp.ne.s32.totalorder %s3066_s21, 0 }
  0xb2   : > { %s734_s17 = scalar_lea.vmem %s3850_s3, %s2490_s24  ;;  %s3420_s14 = scalar_lea.vmem %s3851_s5, %s2490_s24  ;;  %v773_v0 = vld [vmem:[#allocation3] sm:$0xff] (!%p2443_p6)  ;;  %vm775_vm0 = vcmask (!%p2443_p6), 261120   ;;  %v774_v1 = vld [vmem:[#allocation3 + $0x8] sm:$0xff] (!%p2443_p6) }
  0xb3   : > { %s3852_s3 = sld [smem:[#allocation30_spill]]  ;;  %s634_s24 = scalar_lea.vmem [#allocation9], %s3397_s8  ;;  %776 = vst.msk [vmem:[#allocation2] sm:$0xff] (!%p2443_p6), %vm775_vm0, %v773_v0  ;;  %777 = vst.msk [vmem:[#allocation2 + $0x8] sm:$0xff] (!%p2443_p6), %vm775_vm0, %v774_v1 }
  0xb4   : > { %s761_s15 = scalar_lea.vmem %s3853_s10, %s3407_s30  ;;  %s764_s25 = scalar_lea.vmem %s3854_s22, %s3407_s30 }
  0xb5   : > { %772 = sbr.rel (%p2443_p6) target bundleno = 188 (0xbc), region = 100 }
  0xb6   : > { %s767_s1 = scalar_lea.vmem %s3855_s20, %s3407_s30 }
  0xb9   : > { %s3439_s23 = scalar_lea.vmem %s3852_s3, %s2493_s16 }
  0xbc PF: > { %v2818_v2 = vld [vmem:[%s734_s17] sm:$0xff]   ;;  %v3084_v3 = vmov 0.0   ;;  %v2819_v4 = vld [vmem:[%s734_s17 + $0x8] sm:$0xff]   ;;  %vm3085_vm1 = vmmov 0   ;;  %vm804_vm2 = vcmask 261120   ;;  %s3856_s10 = scalar_lea.vmem %s3773_s4, %s3407_s30  ;;  %s3086_s20 = smov 104   ;;  %v1299_v55 = vlaneseq }
  0xbd   : > { %2552 = vmatprep.subr.bf16.mxu0 %v3084_v3  ;;  %2560 = vmatprep.subr.bf16.mxu1 %v3084_v3  ;;  %v3461_v5 = vld [vmem:[#allocation2] sm:$0xff]  ;;  %v3463_v6 = vld [vmem:[#allocation2 + $0x8] sm:$0xff]  ;;  %s3087_s22 = smov 120   ;;  %s3088_s18 = smov 96   ;;  %vm880_vm3 = vcmask 64512   ;;  %vm1413_vm4 = vcmask 1043456  }
  0xbe   : > { %2553 = vmatpush3.bf16.msra.mxu0 %v2818_v2  ;;  %2556 = vmatprep.mubr.msk.bf16.mxu0 %vm3085_vm1, %v3084_v3  ;;  %v780_v7 = vpack.c.bf16 %v3463_v6, %v3461_v5  ;;  %v2444_v8 = vld [vmem:[%s3856_s10] ss:$0 sm:$0xff]  ;;  %s3089_s13 = smov 112   ;;  %s3090_s12 = smov 64   ;;  %v3091_v53 = vmov 1966171168  }
  0xbf   : > { %2554 = vmatprep.subr.bf16.mxu0 %v3084_v3  ;;  %2562 = vmatprep.mubr.msk.bf16.mxu1 %vm3085_vm1, %v3084_v3  ;;  %v1297_v54 = vunpack.c.l.s4 %v3091_v53  ;;  %v1300_v57 = vshrl.u32 %v1299_v55, 7  ;;  %s3857_s16 = sld [smem:[#allocation25_spill]]  ;;  %v2498_v60 = vld [vmem:[#allocation6] sm:$0xff]   ;;  %s3092_s0 = smov 8   ;;  %vm1835_vm5 = vcmask 130048   ;;  %vm1838_vm6 = vcmask 195584  }
  0xc0   : > { %v2499_v0 = vunpack.c.l.bf16 %v2498_v60  ;;  %s3093_s2 = smov 16   ;;  %s3094_s27 = smov 24   ;;  %vm2066_vm7 = vcmask 523264   ;;  %vm2167_vm8 = vcmask 257024  }
  0xc1   : > { %v1298_v56 = vunpack.c.0.s8 %v1297_v54  ;;  %v1312_v62 = vsub.s32 0, %v1300_v57  ;;  %s3858_s3 = scalar_lea.vmem %s3775_s6, %s3407_s30  ;;  %s3859_s10 = scalar_lea.vmem %s3776_s7, %s3407_s30 }
  0xc2   : > { %2555 = vmatpush3.bf16.msra.mxu0 %v2819_v4  ;;  %s3865_s28 = sld [smem:[#allocation34_spill]] }
  0xc3   : > { %2566 = vmatprep.subr.bf16.mxu0 %v3084_v3  ;;  %v1301_v58 = vsub.s32 %v1298_v56, %v1300_v57 }
  0xc5   : > { %2557 = vmatmul.mubr.msk.bf16.vlgmr.msra.gmra.mrb[0].mxu0 %vm804_vm2, %v780_v7  ;;  %v2456_v59 = vld.sshfl [vmem:[%s3857_s16] sm:$0x11 pattern:$0x75316420] }
  0xc6   : > { %2568 = vmatprep.mubr.msk.bf16.mxu0 %vm3085_vm1, %v3084_v3  ;;  %v1302_v61 = vrot.slane %v2456_v59, %v1301_v58  ;;  %v1295_v63 = vcombine.high %v2456_v59, %v2456_v59 }
  0xc8   : > { %v3554_v1 = vrot.slane %v1302_v61, %v1312_v62  ;;  %v1309_v2 = vrot.slane %v1295_v63, %v1301_v58 }
 0x198   : > { %v842_v9 = vpop.f32.mrb[0].mxu0 }
 0x199   : > { %v2558_v10 = vpop.f32.mrb[1].mxu0  ;;  %v843_v12 = vadd.f32 %v2444_v8, %v842_v9 }
 0x19a   : > { %v845_v11 = vpop.f32.mrb[2].mxu0 }
 0x19b   : > { %v846_v13 = vadd.f32 %v2444_v8, %v845_v11  ;;  %v2559_v14 = vpop.f32.mrb[3].mxu0  ;;  %v869_v16 = vpack.c.bf16 %v843_v12, %v843_v12 }
 0x19d   : > { %v2798_v15 = vpack.i.bf16 %v846_v13, %v843_v12  ;;  %v870_v17 = vpack.c.bf16 %v846_v13, %v846_v13  ;;  %v1317_v12 = vrot.slane %v1309_v2, %v1312_v62 }
 0x19f   : > { %2799 = vrot.lane.b32.xlu1 %v2798_v15, %s3086_s20  ;;  %2789 = vrot.lane.b32.xlu0 %v2798_v15, %s3087_s22  ;;  %s3860_s20 = scalar_lea.vmem [#allocation8], %s3397_s8 }
 0x1a3   : > { %878 = vrot.lane.b32.xlu1 %v869_v16, %s3088_s18  ;;  %2794 = vrot.lane.b32.xlu0 %v2798_v15, %s3089_s13 }
 0x1a7   : > { %928 = vrot.lane.b32.xlu0 %v870_v17, %s3088_s18 }
 0x211   : > { %v2800_v18 = vpop.permute.xlu1 %2799  ;;  %v2790_v19 = vpop.permute.xlu0 %2789 }
 0x212   : > { %v2792_v20 = vunpack.i.h.bf16 %v2790_v19  ;;  %v2791_v21 = vunpack.i.l.bf16 %v2790_v19  ;;  %v2801_v29 = vunpack.i.l.bf16 %v2800_v18  ;;  %v2802_v32 = vunpack.i.h.bf16 %v2800_v18 }
 0x214   : > { %v872_v22 = vpack.c.bf16 %v2792_v20, %v2792_v20  ;;  %v871_v23 = vpack.c.bf16 %v2791_v21, %v2791_v21  ;;  %v3494_v35 = vpack.c.bf16 %v2801_v29, %v2801_v29  ;;  %v3497_v36 = vpack.c.bf16 %v2802_v32, %v2802_v32  ;;  %v2505_v32 = vld [vmem:[#allocation6 + $0x8] sm:$0xff]  }
 0x215   : > { %v879_v24 = vpop.permute.xlu1 %878  ;;  %v2795_v25 = vpop.permute.xlu0 %2794  ;;  %v2500_v21 = vunpack.c.h.bf16 %v2498_v60 }
 0x216   : > { %v2797_v26 = vunpack.i.h.bf16 %v2795_v25  ;;  %v2796_v27 = vunpack.i.l.bf16 %v2795_v25  ;;  %977 = vrot.lane.b32.xlu1 %v871_v23, %s3088_s18  ;;  %1026 = vrot.lane.b32.xlu0 %v872_v22, %s3088_s18  ;;  %v885_v28 = vsel %vm880_vm3, %v879_v24, 0 }
 0x217   : > { %2561 = vmatpush3.bf16.xpose.msra.mxu1 %v885_v28 }
 0x218   : > { %v3484_v30 = vpack.c.bf16 %v2797_v26, %v2797_v26  ;;  %v3486_v31 = vpack.c.bf16 %v2796_v27, %v2796_v27  ;;  %2572 = vmatprep.subr.bf16.mxu1 %v3084_v3 }
 0x219   : > { %v929_v33 = vpop.permute.xlu0 %928 }
 0x21a   : > { %v934_v34 = vsel %vm880_vm3, %v929_v33, 0  ;;  %1075 = vrot.lane.b32.xlu1 %v3486_v31, %s3088_s18  ;;  %1124 = vrot.lane.b32.xlu0 %v3484_v30, %s3088_s18 }
 0x21b   : > { %2567 = vmatpush3.bf16.xpose.msra.mxu0 %v934_v34 }
 0x21c   : > { %2578 = vmatprep.subr.bf16.mxu0 %v3084_v3 }
 0x21e   : > { %2563 = vmatmul.mubr.msk.bf16.vlgmr.msra.gmra.mrb[0].mxu1 %vm880_vm3, %v869_v16  ;;  %1173 = vrot.lane.b32.xlu1 %v3494_v35, %s3088_s18 }
 0x21f   : > { %1222 = vrot.lane.b32.xlu0 %v3497_v36, %s3088_s18  ;;  %2574 = vmatprep.mubr.msk.bf16.mxu1 %vm3085_vm1, %v3084_v3 }
 0x222   : > { %1457 = vrot.lane.b32.xlu1 %v870_v17, %s3090_s12  ;;  %2569 = vmatmul.mubr.msk.bf16.vlgmr.msra.gmra.mrb[4].mxu0 %vm880_vm3, %v870_v17 }
 0x223   : > { %1408 = vrot.lane.b32.xlu0 %v869_v16, %s3090_s12  ;;  %2580 = vmatprep.mubr.msk.bf16.mxu0 %vm3085_vm1, %v3084_v3 }
 0x226   : > { %1505 = vrot.lane.b32.xlu1 %v871_v23, %s3090_s12 }
 0x227   : > { %1553 = vrot.lane.b32.xlu0 %v872_v22, %s3090_s12 }
 0x288   : > { %v978_v37 = vpop.permute.xlu1 %977  ;;  %v1027_v38 = vpop.permute.xlu0 %1026 }
 0x289   : > { %v983_v39 = vsel %vm880_vm3, %v978_v37, 0  ;;  %v1032_v40 = vsel %vm880_vm3, %v1027_v38, 0 }
 0x28a   : > { %2573 = vmatpush3.bf16.xpose.msra.mxu1 %v983_v39  ;;  %2579 = vmatpush3.bf16.xpose.msra.mxu0 %v1032_v40  ;;  %v2503_v40 = vunpack.c.l.bf16 %v2505_v32 }
 0x28b   : > { %2584 = vmatprep.subr.bf16.mxu1 %v3084_v3  ;;  %2590 = vmatprep.subr.bf16.mxu0 %v3084_v3 }
 0x28c   : > { %v1076_v41 = vpop.permute.xlu1 %1075  ;;  %v1125_v42 = vpop.permute.xlu0 %1124 }
 0x28d   : > { %v1081_v43 = vsel %vm880_vm3, %v1076_v41, 0  ;;  %v1130_v44 = vsel %vm880_vm3, %v1125_v42, 0 }
 0x290   : > { %v1174_v45 = vpop.permute.xlu1 %1173 }
 0x291   : > { %2575 = vmatmul.mubr.msk.bf16.vlgmr.msra.gmra.mrb[4].mxu1 %vm880_vm3, %v871_v23  ;;  %2581 = vmatmul.mubr.msk.bf16.vlgmr.msra.gmra.mrb[8].mxu0 %vm880_vm3, %v872_v22  ;;  %v1223_v46 = vpop.permute.xlu0 %1222  ;;  %v1179_v47 = vsel %vm880_vm3, %v1174_v45, 0 }
 0x292   : > { %2585 = vmatpush3.bf16.xpose.msra.mxu1 %v1081_v43  ;;  %2591 = vmatpush3.bf16.xpose.msra.mxu0 %v1130_v44  ;;  %v1228_v48 = vsel %vm880_vm3, %v1223_v46, 0 }
 0x293   : > { %2586 = vmatprep.mubr.msk.bf16.mxu1 %vm3085_vm1, %v3084_v3  ;;  %2592 = vmatprep.mubr.msk.bf16.mxu0 %vm3085_vm1, %v3084_v3 }
 0x294   : > { %2596 = vmatprep.subr.bf16.mxu1 %v3084_v3  ;;  %2602 = vmatprep.subr.bf16.mxu0 %v3084_v3  ;;  %v1458_v49 = vpop.permute.xlu1 %1457 }
 0x295   : > { %v1409_v50 = vpop.permute.xlu0 %1408  ;;  %v1463_v51 = vsel %vm1413_vm4, %v1458_v49, 0 }
 0x296   : > { %v1415_v52 = vsel %vm1413_vm4, %v1409_v50, 0 }
 0x299   : > { %2587 = vmatmul.mubr.msk.bf16.vlgmr.msra.gmra.mrb[8].mxu1 %vm880_vm3, %v3486_v31  ;;  %2593 = vmatmul.mubr.msk.bf16.vlgmr.msra.gmra.mrb[12].mxu0 %vm880_vm3, %v3484_v30  ;;  %v1554_v2 = vpop.permute.xlu0 %1553 }
 0x29a   : > { %2597 = vmatpush3.bf16.xpose.msra.mxu1 %v1179_v47  ;;  %2603 = vmatpush3.bf16.xpose.msra.mxu0 %v1228_v48 }
 0x29b   : > { %2598 = vmatprep.mubr.msk.bf16.mxu1 %vm3085_vm1, %v3084_v3  ;;  %2604 = vmatprep.mubr.msk.bf16.mxu0 %vm3085_vm1, %v3084_v3 }
 0x29c   : > { %2608 = vmatprep.subr.bf16.mxu1 %v3084_v3  ;;  %2614 = vmatprep.subr.bf16.mxu0 %v3084_v3 }
 0x2a1   : > { %2599 = vmatmul.mubr.msk.bf16.vlgmr.msra.gmra.mrb[12].mxu1 %vm880_vm3, %v3494_v35  ;;  %2605 = vmatmul.mubr.msk.bf16.vlgmr.msra.gmra.mrb[16].mxu0 %vm880_vm3, %v3497_v36 }
 0x2a2   : > { %2609 = vmatpush3.bf16.msra.mxu1 %v1415_v52  ;;  %2615 = vmatpush3.bf16.msra.mxu0 %v1463_v51  ;;  %v2504_v52 = vunpack.c.h.bf16 %v2505_v32 }
 0x2a3   : > { %2610 = vmatprep.mubr.msk.bf16.mxu1 %vm3085_vm1, %v3084_v3  ;;  %2620 = vmatprep.subr.bf16.mxu1 %v3084_v3 }
 0x2a4   : > { %2616 = vmatprep.mubr.msk.bf16.mxu0 %vm3085_vm1, %v3084_v3  ;;  %2626 = vmatprep.subr.bf16.mxu0 %v3084_v3 }
 0x2f1   : > { %v921_v4 = vpop.f32.mrb[0].mxu1 }
 0x2f2   : > { %v1278_v7 = vadd.f32 %v2499_v0, %v921_v4  ;;  %v2564_v8 = vpop.f32.mrb[1].mxu1 }
 0x2f3   : > { %v924_v9 = vpop.f32.mrb[2].mxu1 }
 0x2f4   : > { %v2565_v10 = vpop.f32.mrb[3].mxu1  ;;  %v1320_v11 = vadd.f32 %v3554_v1, %v1278_v7 }
 0x2f5   : > { %v970_v13 = vpop.f32.mrb[4].mxu0 }
 0x2f6   : > { %v1279_v14 = vadd.f32 %v2499_v0, %v970_v13  ;;  %v2570_v15 = vpop.f32.mrb[5].mxu0  ;;  %v1328_v16 = vsel %vm880_vm3, %v1320_v11, -inf  ;;  %v1506_v0 = vpop.permute.xlu1 %1505 }
 0x2f7   : > { %1329 = vmax.xlane.f32.xlu1 %v1328_v16  ;;  %v973_v17 = vpop.f32.mrb[6].mxu0  ;;  %v1511_v15 = vsel %vm1413_vm4, %v1506_v0, 0  ;;  %v1559_v16 = vsel %vm1413_vm4, %v1554_v2, 0 }
 0x2f8   : > { %v2571_v18 = vpop.f32.mrb[7].mxu0  ;;  %v1321_v19 = vadd.f32 %v1317_v12, %v1279_v14 }
 0x2fa   : > { %v1331_v20 = vsel %vm880_vm3, %v1321_v19, -inf }
 0x2fb   : > { %1332 = vmax.xlane.f32.xlu0 %v1331_v20 }
 0x308   : > { %1601 = vrot.lane.b32.xlu1 %v3486_v31, %s3090_s12 }
 0x364   : > { %v1019_v22 = vpop.f32.mrb[4].mxu1  ;;  %v1068_v23 = vpop.f32.mrb[8].mxu0 }
 0x365   : > { %v1280_v24 = vadd.f32 %v2500_v21, %v1019_v22  ;;  %v1281_v25 = vadd.f32 %v2500_v21, %v1068_v23  ;;  %v2576_v26 = vpop.f32.mrb[5].mxu1  ;;  %v2582_v27 = vpop.f32.mrb[9].mxu0 }
 0x366   : > { %v1022_v28 = vpop.f32.mrb[6].mxu1  ;;  %v1071_v29 = vpop.f32.mrb[10].mxu0 }
 0x367   : > { %v2577_v33 = vpop.f32.mrb[7].mxu1  ;;  %v2583_v34 = vpop.f32.mrb[11].mxu0  ;;  %v3562_v37 = vadd.f32 %v3554_v1, %v1280_v24  ;;  %v3564_v38 = vadd.f32 %v1317_v12, %v1281_v25 }
 0x369   : > { %v1334_v31 = vsel %vm880_vm3, %v3562_v37, -inf  ;;  %v1337_v39 = vsel %vm880_vm3, %v3564_v38, -inf }
 0x36a   : > { %1335 = vmax.xlane.f32.xlu0 %v1334_v31  ;;  %1338 = vmax.xlane.f32.xlu1 %v1337_v39 }
 0x36c   : > { %v1117_v41 = vpop.f32.mrb[8].mxu1  ;;  %v1166_v42 = vpop.f32.mrb[12].mxu0 }
 0x36d   : > { %v1283_v43 = vadd.f32 %v2503_v40, %v1166_v42  ;;  %v2588_v44 = vpop.f32.mrb[9].mxu1  ;;  %v2594_v45 = vpop.f32.mrb[13].mxu0 }
 0x36e   : > { %v1120_v46 = vpop.f32.mrb[10].mxu1  ;;  %v1169_v47 = vpop.f32.mrb[14].mxu0 }
 0x36f   : > { %v2589_v48 = vpop.f32.mrb[11].mxu1  ;;  %v2595_v49 = vpop.f32.mrb[15].mxu0  ;;  %v1325_v50 = vadd.f32 %v1317_v12, %v1283_v43 }
 0x371   : > { %v1343_v51 = vsel %vm880_vm3, %v1325_v50, -inf }
 0x372   : > { %1344 = vmax.xlane.f32.xlu1 %v1343_v51 }
 0x374   : > { %v1215_v53 = vpop.f32.mrb[12].mxu1  ;;  %v1264_v54 = vpop.f32.mrb[16].mxu0 }
 0x375   : > { %v1285_v55 = vadd.f32 %v2504_v52, %v1264_v54  ;;  %v2600_v56 = vpop.f32.mrb[13].mxu1  ;;  %v2606_v57 = vpop.f32.mrb[17].mxu0  ;;  %v1284_v17 = vadd.f32 %v2504_v52, %v1215_v53 }
 0x376   : > { %v1218_v58 = vpop.f32.mrb[14].mxu1  ;;  %v1267_v59 = vpop.f32.mrb[18].mxu0 }
 0x377   : > { %v2601_v60 = vpop.f32.mrb[15].mxu1  ;;  %v2607_v61 = vpop.f32.mrb[19].mxu0  ;;  %v3571_v62 = vadd.f32 %v1317_v12, %v1285_v55  ;;  %v1326_v20 = vadd.f32 %v3554_v1, %v1284_v17 }
 0x379   : > { %v1349_v63 = vsel %vm880_vm3, %v3571_v62, -inf  ;;  %v1346_v21 = vsel %vm880_vm3, %v1326_v20, -inf }
 0x37a   : > { %1350 = vmax.xlane.f32.xlu1 %v1349_v63 }
 0x380   : > { %1649 = vrot.lane.b32.xlu0 %v3484_v30, %s3090_s12  ;;  %v1282_v30 = vadd.f32 %v2503_v40, %v1117_v41 }
 0x382   : > { %v1324_v18 = vadd.f32 %v3554_v1, %v1282_v30 }
 0x384   : > { %v1330_v4 = vpop.xlane.xlu1 %1329 }
 0x385   : > { %v1352_v7 = vsub.f32 %v1320_v11, %v1330_v4 }
 0x387   : > { %v1360_v8 = vmul.f32 1.442695, %v1352_v7 }
 0x388   : > { %v1333_v9 = vpop.xlane.xlu0 %1332  ;;  %v1602_v22 = vpop.permute.xlu1 %1601 }
 0x389   : > { %2828 = vpow2.f32 %v1360_v8  ;;  %v1353_v10 = vsub.f32 %v1321_v19, %v1333_v9  ;;  %v1340_v19 = vsel %vm880_vm3, %v1324_v18, -inf  ;;  %v1607_v42 = vsel %vm1413_vm4, %v1602_v22, 0 }
 0x38b   : > { %v1362_v13 = vmul.f32 1.442695, %v1353_v10  ;;  %1697 = vrot.lane.b32.xlu1 %v3494_v35, %s3090_s12 }
 0x38d   : > { %2830 = vpow2.f32 %v1362_v13 }
 0x393   : > { %v3579_v12 = vpop.eup %2828 }
 0x394   : > { %v1400_v14 = vpack.c.bf16 %v3579_v12, %v3579_v12  ;;  %v1376_v7 = vsel %vm880_vm3, %v3579_v12, 0.0 }
 0x396   : > { %2611 = vmatmul.mubr.msk.bf16.vlgmr.msra.gmra.mrb[16].mxu1 %vm880_vm3, %v1400_v14 }
 0x397   : > { %v3585_v11 = vpop.eup %2830  ;;  %2621 = vmatpush3.bf16.msra.mxu1 %v1511_v15  ;;  %2622 = vmatprep.mubr.msk.bf16.mxu1 %vm3085_vm1, %v3084_v3 }
 0x398   : > { %v1401_v35 = vpack.c.bf16 %v3585_v11, %v3585_v11  ;;  %2632 = vmatprep.subr.bf16.mxu1 %v3084_v3 }
 0x39a   : > { %2617 = vmatmul.mubr.msk.bf16.vlgmr.msra.gmra.mrb[20].mxu0 %vm880_vm3, %v1401_v35 }
 0x39b   : > { %2627 = vmatpush3.bf16.msra.mxu0 %v1559_v16  ;;  %2628 = vmatprep.mubr.msk.bf16.mxu0 %vm3085_vm1, %v3084_v3 }
 0x39c   : > { %2638 = vmatprep.subr.bf16.mxu0 %v3084_v3 }
 0x39f   : > { %1341 = vmax.xlane.f32.xlu0 %v1340_v19 }
 0x3a3   : > { %1347 = vmax.xlane.f32.xlu0 %v1346_v21 }
 0x3b9   : > { %1745 = vrot.lane.b32.xlu0 %v3497_v36, %s3090_s12 }
 0x3f7   : > { %v1336_v23 = vpop.xlane.xlu0 %1335  ;;  %v1339_v24 = vpop.xlane.xlu1 %1338 }
 0x3f8   : > { %v1354_v25 = vsub.f32 %v3562_v37, %v1336_v23  ;;  %v1355_v26 = vsub.f32 %v3564_v38, %v1339_v24 }
 0x3fa   : > { %v1364_v27 = vmul.f32 1.442695, %v1354_v25  ;;  %v1366_v28 = vmul.f32 1.442695, %v1355_v26 }
 0x3fb   : > { %v1650_v31 = vpop.permute.xlu0 %1649 }
 0x3fc   : > { %2832 = vpow2.f32 %v1364_v27  ;;  %v1655_v43 = vsel %vm1413_vm4, %v1650_v31, 0 }
 0x3fd   : > { %2834 = vpow2.f32 %v1366_v28 }
 0x3ff   : > { %v1345_v29 = vpop.xlane.xlu1 %1344 }
 0x400   : > { %v1357_v1 = vsub.f32 %v1325_v50, %v1345_v29  ;;  %v1379_v50 = vsel %vm880_vm3, %v3585_v11, 0.0 }
 0x402   : > { %v1370_v32 = vmul.f32 1.442695, %v1357_v1 }
 0x404   : > { %2836 = vpow2.f32 %v1370_v32 }
 0x406   : > { %v2833_v33 = vpop.eup %2832 }
 0x407   : > { %v2835_v34 = vpop.eup %2834  ;;  %v1351_v39 = vpop.xlane.xlu1 %1350  ;;  %v1382_v36 = vsel %vm880_vm3, %v2833_v33, 0.0  ;;  %v1402_v40 = vpack.c.bf16 %v2833_v33, %v2833_v33 }
 0x408   : > { %v1359_v41 = vsub.f32 %v3571_v62, %v1351_v39  ;;  %v1385_v37 = vsel %vm880_vm3, %v2835_v34, 0.0  ;;  %1383 = vadd.xlane.f32.xlu1 %v1382_v36  ;;  %v1403_v38 = vpack.c.bf16 %v2835_v34, %v2835_v34 }
 0x409   : > { %1386 = vadd.xlane.f32.xlu0 %v1385_v37  ;;  %2623 = vmatmul.mubr.msk.bf16.vlgmr.msra.gmra.mrb[20].mxu1 %vm880_vm3, %v1402_v40  ;;  %v2820_v40 = vld [vmem:[%s3420_s14] sm:$0xff]  }
 0x40a   : > { %v1374_v44 = vmul.f32 1.442695, %v1359_v41  ;;  %2629 = vmatmul.mubr.msk.bf16.vlgmr.msra.gmra.mrb[24].mxu0 %vm880_vm3, %v1403_v38  ;;  %2633 = vmatpush3.bf16.msra.mxu1 %v1607_v42 }
 0x40b   : > { %2639 = vmatpush3.bf16.msra.mxu0 %v1655_v43  ;;  %2640 = vmatprep.mubr.msk.bf16.mxu0 %vm3085_vm1, %v3084_v3  ;;  %v1698_v61 = vpop.permute.xlu1 %1697 }
 0x40c   : > { %2838 = vpow2.f32 %v1374_v44  ;;  %2650 = vmatprep.subr.bf16.mxu0 %v3084_v3  ;;  %2634 = vmatprep.mubr.msk.bf16.mxu1 %vm3085_vm1, %v3084_v3  ;;  %v1703_v0 = vsel %vm1413_vm4, %v1698_v61, 0 }
 0x40d   : > { %2644 = vmatprep.subr.bf16.mxu1 %v3084_v3 }
 0x40e   : > { %v2837_v45 = vpop.eup %2836 }
 0x40f   : > { %v1391_v46 = vsel %vm880_vm3, %v2837_v45, 0.0  ;;  %v1405_v47 = vpack.c.bf16 %v2837_v45, %v2837_v45 }
 0x410   : > { %1392 = vadd.xlane.f32.xlu1 %v1391_v46 }
 0x412   : > { %2641 = vmatmul.mubr.msk.bf16.vlgmr.msra.gmra.mrb[28].mxu0 %vm880_vm3, %v1405_v47 }
 0x413   : > { %2652 = vmatprep.mubr.msk.bf16.mxu0 %vm3085_vm1, %v3084_v3 }
 0x416   : > { %v2839_v48 = vpop.eup %2838 }
 0x417   : > { %v1397_v49 = vsel %vm880_vm3, %v2839_v48, 0.0  ;;  %v1407_v59 = vpack.c.bf16 %v2839_v48, %v2839_v48 }
 0x418   : > { %1398 = vadd.xlane.f32.xlu1 %v1397_v49 }
 0x41c   : > { %1380 = vadd.xlane.f32.xlu1 %v1379_v50 }
 0x42c   : > { %v1342_v51 = vpop.xlane.xlu0 %1341 }
 0x42d   : > { %v1356_v52 = vsub.f32 %v1324_v18, %v1342_v51  ;;  %v2821_v51 = vld [vmem:[%s3420_s14 + $0x8] sm:$0xff]  }
 0x42f   : > { %v1368_v53 = vmul.f32 1.442695, %v1356_v52 }
 0x430   : > { %v1348_v54 = vpop.xlane.xlu0 %1347 }
 0x431   : > { %2840 = vpow2.f32 %v1368_v53  ;;  %v1358_v55 = vsub.f32 %v1326_v20, %v1348_v54 }
 0x433   : > { %v1372_v56 = vmul.f32 1.442695, %v1358_v55 }
 0x434   : > { %v1746_v57 = vpop.permute.xlu0 %1745 }
 0x435   : > { %2842 = vpow2.f32 %v1372_v56  ;;  %v1751_v58 = vsel %vm1413_vm4, %v1746_v57, 0 }
 0x436   : > { %2651 = vmatpush3.bf16.msra.mxu0 %v1751_v58 }
 0x437   : > { %2664 = vmatprep.subr.bf16.mxu0 %v3084_v3 }
 0x439   : > { %2653 = vmatmul.mubr.msk.bf16.vlgmr.msra.gmra.mrb[32].mxu0 %vm880_vm3, %v1407_v59 }
 0x43a   : > { %2668 = vmatprep.mubr.msk.bf16.mxu0 %vm3085_vm1, %v3084_v3 }
 0x43b   : > { %v2841_v60 = vpop.eup %2840 }
 0x43c   : > { %v1388_v62 = vsel %vm880_vm3, %v2841_v60, 0.0  ;;  %v1404_v63 = vpack.c.bf16 %v2841_v60, %v2841_v60 }
 0x43d   : > { %1389 = vadd.xlane.f32.xlu0 %v1388_v62 }
 0x43e   : > { %2635 = vmatmul.mubr.msk.bf16.vlgmr.msra.gmra.mrb[24].mxu1 %vm880_vm3, %v1404_v63 }
 0x43f   : > { %v2843_v2 = vpop.eup %2842  ;;  %2645 = vmatpush3.bf16.msra.mxu1 %v1703_v0  ;;  %2646 = vmatprep.mubr.msk.bf16.mxu1 %vm3085_vm1, %v3084_v3 }
 0x440   : > { %v1394_v4 = vsel %vm880_vm3, %v2843_v2, 0.0  ;;  %2656 = vmatprep.subr.bf16.mxu1 %v3084_v3  ;;  %v1406_v8 = vpack.c.bf16 %v2843_v2, %v2843_v2 }
 0x441   : > { %1395 = vadd.xlane.f32.xlu0 %v1394_v4 }
 0x445   : > { %1377 = vadd.xlane.f32.xlu0 %v1376_v7 }
 0x446   : > { %2647 = vmatmul.mubr.msk.bf16.vlgmr.msra.gmra.mrb[28].mxu1 %vm880_vm3, %v1406_v8 }
 0x447   : > { %2660 = vmatprep.mubr.msk.bf16.mxu1 %vm3085_vm1, %v3084_v3  ;;  %2657 = vmatpush3.bf16.msra.mxu1 %v2820_v40 }
 0x448   : > { %2658 = vmatprep.subr.bf16.mxu1 %v3084_v3 }
 0x44b   : > { %2659 = vmatpush3.bf16.msra.mxu1 %v2821_v51 }
 0x44c   : > { %2672 = vmatprep.subr.bf16.mxu1 %v3084_v3 }
 0x469   : > { %v3642_v9 = vpop.f32.mrb[16].mxu1 }
 0x46a   : > { %v2612_v10 = vpop.f32.mrb[17].mxu1 }
 0x46b   : > { %v1454_v13 = vpop.f32.mrb[18].mxu1 }
 0x46c   : > { %v2613_v14 = vpop.f32.mrb[19].mxu1 }
 0x46d   : > { %v3644_v15 = vpop.f32.mrb[20].mxu0 }
 0x46e   : > { %v2618_v30 = vpop.f32.mrb[21].mxu0 }
 0x46f   : > { %v1502_v11 = vpop.f32.mrb[22].mxu0 }
 0x470   : > { %v2619_v35 = vpop.f32.mrb[23].mxu0 }
 0x495   : > { %v1384_v16 = vpop.xlane.xlu1 %1383 }
 0x496   : > { %v1387_v17 = vpop.xlane.xlu0 %1386  ;;  %2844 = vrcp.f32 %v1384_v16 }
 0x497   : > { %2846 = vrcp.f32 %v1387_v17 }
 0x49d   : > { %v1393_v31 = vpop.xlane.xlu1 %1392 }
 0x49e   : > { %2848 = vrcp.f32 %v1393_v31 }
 0x4a0   : > { %v2845_v12 = vpop.eup %2844 }
 0x4a1   : > { %v2847_v19 = vpop.eup %2846 }
 0x4a5   : > { %v1399_v36 = vpop.xlane.xlu1 %1398 }
 0x4a8   : > { %v2849_v44 = vpop.eup %2848 }
 0x4a9   : > { %v1381_v63 = vpop.xlane.xlu1 %1380 }
 0x4ca   : > { %v1390_v39 = vpop.xlane.xlu0 %1389 }
 0x4cb   : > { %2850 = vrcp.f32 %v1390_v39 }
 0x4cc   : > { %2852 = vrcp.f32 %v1399_v36 }
 0x4ce   : > { %v1396_v41 = vpop.xlane.xlu0 %1395 }
 0x4cf   : > { %2854 = vrcp.f32 %v1396_v41 }
 0x4d0   : > { %2856 = vrcp.f32 %v1381_v63 }
 0x4d2   : > { %v1378_v0 = vpop.xlane.xlu0 %1377 }
 0x4d3   : > { %2858 = vrcp.f32 %v1378_v0  ;;  %v2826_v0 = vld [vmem:[%s3439_s23 + $0x10] sm:$0xff]  }
 0x4d5   : > { %v2851_v45 = vpop.eup %2850 }
 0x4d6   : > { %v2853_v54 = vpop.eup %2852 }
 0x4d9   : > { %v2855_v55 = vpop.eup %2854 }
 0x4da   : > { %v2857_v4 = vpop.eup %2856 }
 0x4db   : > { %v1802_v35 = vmul.f32 %v2857_v4, %v3644_v15  ;;  %v2471_v4 = vld [vmem:[%s634_s24] ss:$0 sm:$0xff] }
 0x4dc   : > { %v1547_v18 = vpop.f32.mrb[20].mxu1 }
 0x4dd   : > { %v1803_v20 = vmul.f32 %v2845_v12, %v1547_v18  ;;  %v1595_v21 = vpop.f32.mrb[24].mxu0  ;;  %v2624_v22 = vpop.f32.mrb[21].mxu1 }
 0x4de   : > { %v1804_v23 = vmul.f32 %v2847_v19, %v1595_v21  ;;  %v2630_v24 = vpop.f32.mrb[25].mxu0  ;;  %v1550_v25 = vpop.f32.mrb[22].mxu1 }
 0x4df   : > { %v1598_v26 = vpop.f32.mrb[26].mxu0  ;;  %v2625_v27 = vpop.f32.mrb[23].mxu1 }
 0x4e0   : > { %v2803_v28 = vpack.i.bf16 %v1804_v23, %v1803_v20  ;;  %v2631_v29 = vpop.f32.mrb[27].mxu0  ;;  %v2859_v8 = vpop.eup %2858 }
 0x4e1   : > { %v1801_v11 = vmul.f32 %v2859_v8, %v3642_v9  ;;  %v2465_v9 = vld [vmem:[%s3858_s3] ss:$0 sm:$0xff] }
 0x4e2   : > { %2804 = vrot.lane.b32.xlu0 %v2803_v28, %s3092_s0  ;;  %s3864_s0 = sld [smem:[#allocation21_spill]] }
 0x4e5   : > { %v1691_v1 = vpop.f32.mrb[28].mxu0 }
 0x4e6   : > { %v2642_v32 = vpop.f32.mrb[29].mxu0  ;;  %v1806_v47 = vmul.f32 %v2849_v44, %v1691_v1  ;;  %v2823_v44 = vld [vmem:[%s3433_s26 + $0x8] sm:$0xff]  }
 0x4e7   : > { %v1694_v33 = vpop.f32.mrb[30].mxu0 }
 0x4e8   : > { %v2643_v34 = vpop.f32.mrb[31].mxu0  ;;  %p3866_p3 = scmp.ne.s32.totalorder %s3864_s0, 0 }
 0x50c   : > { %v1787_v37 = vpop.f32.mrb[32].mxu0 }
 0x50d   : > { %v2654_v38 = vpop.f32.mrb[33].mxu0  ;;  %v1808_v57 = vmul.f32 %v2853_v54, %v1787_v37 }
 0x50e   : > { %v1790_v42 = vpop.f32.mrb[34].mxu0 }
 0x50f   : > { %v2655_v43 = vpop.f32.mrb[35].mxu0 }
 0x510   : > { %v2822_v43 = vld [vmem:[%s3433_s26] sm:$0xff]  }
 0x511   : > { %v1643_v46 = vpop.f32.mrb[24].mxu1  ;;  %2665 = vmatpush3.bf16.msra.mxu0 %v2822_v43  ;;  %v2482_v43 = vld [vmem:[%s767_s1] ss:$0 sm:$0xff]  ;;  %s3095_s1 = smov [#allocation10]  }
 0x512   : > { %v1805_v48 = vmul.f32 %v2851_v45, %v1643_v46  ;;  %v2636_v49 = vpop.f32.mrb[25].mxu1  ;;  %2666 = vmatprep.subr.bf16.mxu0 %v3084_v3  ;;  %v2824_v45 = vld [vmem:[%s3439_s23] sm:$0xff]   ;;  %v2825_v46 = vld [vmem:[%s3439_s23 + $0x8] sm:$0xff]   ;;  %s2988_s26 = sshll.u32 %s3095_s1, 4  ;;  %s2989_s26 = int_to_ptr.vmem [resolvable:$false] %s2988_s26 }
 0x513   : > { %v1646_v50 = vpop.f32.mrb[26].mxu1  ;;  %s2990_s5 = scalar_lea.vmem %s2989_s26, 256 }
 0x514   : > { %v2808_v52 = vpack.i.bf16 %v1806_v47, %v1805_v48  ;;  %v2637_v53 = vpop.f32.mrb[27].mxu1 }
 0x515   : > { %2667 = vmatpush3.bf16.msra.mxu0 %v2823_v44 }
 0x516   : > { %2809 = vrot.lane.b32.xlu1 %v2808_v52, %s3093_s2  ;;  %s2496_s2 = sshll.u32 %s3066_s21, 7  ;;  %s2171_s21 = scalar_lea.sflag [#allocation5], %s3397_s8 }
 0x517   : > { %s3713_s3 = scalar_lea.hbm %s3865_s28, %s2496_s2 }
 0x519   : > { %v1739_v56 = vpop.f32.mrb[28].mxu1 }
 0x51a   : > { %v1807_v58 = vmul.f32 %v2855_v55, %v1739_v56  ;;  %v2648_v59 = vpop.f32.mrb[29].mxu1  ;;  %v2469_v55 = vld [vmem:[%s3859_s10] ss:$0 sm:$0xff] }
 0x51b   : > { %v1742_v60 = vpop.f32.mrb[30].mxu1  ;;  %v2470_v59 = vld [vmem:[%s3860_s20] ss:$0 sm:$0xff] }
 0x51c   : > { %v2813_v61 = vpack.i.bf16 %v1808_v57, %v1807_v58  ;;  %v2649_v62 = vpop.f32.mrb[31].mxu1 }
 0x51e   : > { %2814 = vrot.lane.b32.xlu1 %v2813_v61, %s3094_s27  ;;  %s2186_s27 = sshll.u32 %s3454_s11, 4  ;;  %s3717_s27 = int_to_ptr.vmem [resolvable:$true] %s2186_s27 }
 0x51f   : > { %s2984_s30 = scalar_lea.vmem %s3717_s27, 128  ;;  %p2991_p8 = scmp.lt.s32.totalorder %s3717_s27, %s2989_s26 }
 0x520   : > { %p2985_p1 = scmp.ne.s32.totalorder %s3717_s27, %s2984_s30  ;;  %p2992_p12 = scmp.lt.s32.totalorder %s2990_s5, %s2984_s30 }
 0x522   : > { %p2986_p13 = pnand %p2985_p1, %p3866_p3  ;;  %p2993_p11 = por %p2992_p12, %p2991_p8 }
 0x524   : > { %p2987_p10 = pneg %p2986_p13 }
 0x526   : > { %p2994_p0 = pnand %p2993_p11, %p2987_p10 }
 0x554   : > { %v2805_v2 = vpop.permute.xlu0 %2804 }
 0x555   : > { %v2807_v10 = vunpack.i.h.bf16 %v2805_v2  ;;  %v2806_v13 = vunpack.i.l.bf16 %v2805_v2  ;;  %v2827_v2 = vld [vmem:[%s3439_s23 + $0x18] sm:$0xff]  }
 0x557   : > { %v1834_v17 = vsel %vm880_vm3, %v1802_v35, %v2807_v10  ;;  %v1833_v12 = vsel %vm880_vm3, %v1801_v11, %v2806_v13 }
 0x588   : > { %v2810_v7 = vpop.permute.xlu1 %2809 }
 0x589   : > { %v2812_v14 = vunpack.i.h.bf16 %v2810_v7  ;;  %v2811_v30 = vunpack.i.l.bf16 %v2810_v7 }
 0x58b   : > { %v1837_v20 = vsel %vm1835_vm5, %v1834_v17, %v2812_v14  ;;  %v1836_v21 = vsel %vm1835_vm5, %v1833_v12, %v2811_v30 }
 0x590   : > { %v2815_v16 = vpop.permute.xlu1 %2814 }
 0x591   : > { %v2817_v18 = vunpack.i.h.bf16 %v2815_v16  ;;  %v2816_v19 = vunpack.i.l.bf16 %v2815_v16 }
 0x593   : > { %v1840_v22 = vsel %vm1838_vm6, %v1837_v20, %v2817_v18  ;;  %v1839_v23 = vsel %vm1838_vm6, %v1836_v21, %v2816_v19 }
 0x594   : > { %v1841_v24 = vpack.c.bf16 %v1840_v22, %v1839_v23 }
 0x596   : > { %2661 = vmatmul.mubr.msk.bf16.vlgmr.msra.gmra.mrb[32].mxu1 %vm804_vm2, %v1841_v24 }
 0x597   : > { %2680 = vmatprep.mubr.msk.bf16.mxu1 %vm3085_vm1, %v3084_v3  ;;  %2673 = vmatpush3.bf16.msra.mxu1 %v2824_v45 }
 0x598   : > { %2674 = vmatprep.subr.bf16.mxu1 %v3084_v3 }
 0x59b   : > { %2675 = vmatpush3.bf16.msra.mxu1 %v2825_v46 }
 0x59c   : > { %2676 = vmatprep.subr.bf16.mxu1 %v3084_v3 }
 0x59f   : > { %2677 = vmatpush3.bf16.msra.mxu1 %v2826_v0 }
 0x5a0   : > { %2678 = vmatprep.subr.bf16.mxu1 %v3084_v3  ;;  %v2475_v3 = vld [vmem:[%s761_s15] ss:$0 sm:$0xff] }
 0x5a3   : > { %2679 = vmatpush3.bf16.msra.mxu1 %v2827_v2 }
 0x669   : > { %v1902_v15 = vpop.f32.mrb[32].mxu1 }
 0x66a   : > { %v1903_v25 = vadd.f32 %v2465_v9, %v1902_v15  ;;  %v2662_v26 = vpop.f32.mrb[33].mxu1 }
 0x66b   : > { %v1905_v27 = vpop.f32.mrb[34].mxu1 }
 0x66c   : > { %v1906_v28 = vadd.f32 %v2465_v9, %v1905_v27  ;;  %v2663_v29 = vpop.f32.mrb[35].mxu1  ;;  %v1909_v1 = vadd.f32 %v1903_v25, %v3461_v5 }
 0x66e   : > { %v1913_v32 = vsel %vm804_vm2, %v1909_v1, 0.0  ;;  %v1910_v33 = vadd.f32 %v1906_v28, %v3463_v6 }
 0x66f   : > { %1914 = vadd.xlane.f32.xlu0 %v1913_v32 }
 0x670   : > { %v1916_v34 = vsel %vm804_vm2, %v1910_v33, 0.0 }
 0x671   : > { %1917 = vadd.xlane.f32.xlu1 %v1916_v34 }
 0x6fc   : > { %v1915_v31 = vpop.xlane.xlu0 %1914 }
 0x6fd   : > { %v1920_v39 = vmul.f32 0.03125, %v1915_v31 }
 0x6fe   : > { %v1918_v36 = vpop.xlane.xlu1 %1917 }
 0x6ff   : > { %v1922_v40 = vsub.f32 %v1909_v1, %v1920_v39  ;;  %v1921_v41 = vmul.f32 0.03125, %v1918_v36 }
 0x701   : > { %v1923_v37 = vsub.f32 %v1910_v33, %v1921_v41  ;;  %v1924_v38 = vmul.f32 %v1922_v40, %v1922_v40 }
 0x703   : > { %v1926_v5 = vsel %vm804_vm2, %v1924_v38, 0.0  ;;  %v1925_v42 = vmul.f32 %v1923_v37, %v1923_v37 }
 0x704   : > { %1927 = vadd.xlane.f32.xlu0 %v1926_v5  ;;  %v2481_v5 = vld [vmem:[%s764_s25] ss:$0 sm:$0xff] }
 0x705   : > { %v1929_v6 = vsel %vm804_vm2, %v1925_v42, 0.0 }
 0x708   : > { %1930 = vadd.xlane.f32.xlu0 %v1929_v6 }
 0x791   : > { %v1928_v47 = vpop.xlane.xlu0 %1927 }
 0x792   : > { %v1932_v48 = vmul.f32 0.03125, %v1928_v47 }
 0x794   : > { %v1934_v49 = vadd.f32 1e-05, %v1932_v48 }
 0x795   : > { %v1931_v50 = vpop.xlane.xlu0 %1930 }
 0x796   : > { %2860 = vrsqrt.f32 %v1934_v49  ;;  %v1933_v51 = vmul.f32 0.03125, %v1931_v50 }
 0x798   : > { %v1935_v52 = vadd.f32 1e-05, %v1933_v51 }
 0x79a   : > { %2862 = vrsqrt.f32 %v1935_v52 }
 0x7a0   : > { %v2861_v53 = vpop.eup %2860 }
 0x7a1   : > { %v1938_v54 = vmul.f32 %v2861_v53, %v1922_v40 }
 0x7a3   : > { %v1946_v57 = vmul.f32 %v2469_v55, %v1938_v54 }
 0x7a4   : > { %v2863_v56 = vpop.eup %2862 }
 0x7a5   : > { %v1939_v58 = vmul.f32 %v2863_v56, %v1923_v37  ;;  %v1954_v61 = vadd.f32 %v2470_v59, %v1946_v57 }
 0x7a7   : > { %v1947_v60 = vmul.f32 %v2469_v55, %v1939_v58 }
 0x7a9   : > { %v1955_v62 = vadd.f32 %v2470_v59, %v1947_v60 }
 0x7ab   : > { %v1956_v63 = vpack.c.bf16 %v1955_v62, %v1954_v61 }
 0x7ad   : > { %2669 = vmatmul.mubr.msk.bf16.vlgmr.msra.gmra.mrb[36].mxu0 %vm804_vm2, %v1956_v63 }
 0x880   : > { %v2017_v7 = vpop.f32.mrb[36].mxu0 }
 0x881   : > { %v2018_v8 = vadd.f32 %v2471_v4, %v2017_v7  ;;  %v2670_v10 = vpop.f32.mrb[37].mxu0 }
 0x882   : > { %v2020_v13 = vpop.f32.mrb[38].mxu0 }
 0x883   : > { %v2021_v14 = vadd.f32 %v2471_v4, %v2020_v13  ;;  %v2671_v30 = vpop.f32.mrb[39].mxu0  ;;  %v2024_v11 = vmax.f32 %v2018_v8, 0.0 }
 0x885   : > { %v2025_v35 = vmax.f32 %v2021_v14, 0.0 }
 0x887   : > { %v2026_v16 = vpack.c.bf16 %v2025_v35, %v2024_v11 }
 0x889   : > { %2681 = vmatmul.mubr.msk.bf16.vlgmr.msra.gmra.mrb[36].mxu1 %vm2066_vm7, %v2026_v16 }
 0x95c   : > { %v2104_v17 = vpop.f32.mrb[36].mxu1 }
 0x95d   : > { %v2105_v12 = vadd.f32 %v2475_v3, %v2104_v17  ;;  %v2682_v18 = vpop.f32.mrb[37].mxu1 }
 0x95e   : > { %v2107_v19 = vpop.f32.mrb[38].mxu1 }
 0x95f   : > { %v2108_v20 = vadd.f32 %v2475_v3, %v2107_v19  ;;  %v2683_v21 = vpop.f32.mrb[39].mxu1  ;;  %v2111_v22 = vadd.f32 %v2105_v12, %v1954_v61 }
 0x961   : > { %v2115_v23 = vsel %vm804_vm2, %v2111_v22, 0.0  ;;  %v2112_v24 = vadd.f32 %v2108_v20, %v1955_v62 }
 0x962   : > { %2116 = vadd.xlane.f32.xlu1 %v2115_v23 }
 0x963   : > { %v2118_v9 = vsel %vm804_vm2, %v2112_v24, 0.0 }
 0x964   : > { %2119 = vadd.xlane.f32.xlu0 %v2118_v9 }
 0x9ef   : > { %v2117_v15 = vpop.xlane.xlu1 %2116 }
 0x9f0   : > { %v2121_v25 = vmul.f32 0.03125, %v2117_v15 }
 0x9f1   : > { %v2120_v26 = vpop.xlane.xlu0 %2119 }
 0x9f2   : > { %v2123_v27 = vsub.f32 %v2111_v22, %v2121_v25  ;;  %v2122_v28 = vmul.f32 0.03125, %v2120_v26 }
 0x9f4   : > { %v2124_v29 = vsub.f32 %v2112_v24, %v2122_v28  ;;  %v2125_v1 = vmul.f32 %v2123_v27, %v2123_v27 }
 0x9f6   : > { %v2127_v32 = vsel %vm804_vm2, %v2125_v1, 0.0  ;;  %v2126_v33 = vmul.f32 %v2124_v29, %v2124_v29 }
 0x9f7   : > { %2128 = vadd.xlane.f32.xlu1 %v2127_v32 }
 0x9f8   : > { %v2130_v34 = vsel %vm804_vm2, %v2126_v33, 0.0 }
 0x9f9   : > { %2131 = vadd.xlane.f32.xlu0 %v2130_v34 }
 0xa84   : > { %v2129_v31 = vpop.xlane.xlu1 %2128 }
 0xa85   : > { %v2133_v39 = vmul.f32 0.03125, %v2129_v31 }
 0xa86   : > { %v2132_v36 = vpop.xlane.xlu0 %2131 }
 0xa87   : > { %v2135_v40 = vadd.f32 1e-05, %v2133_v39  ;;  %v2134_v41 = vmul.f32 0.03125, %v2132_v36 }
 0xa89   : > { %2864 = vrsqrt.f32 %v2135_v40  ;;  %v2136_v37 = vadd.f32 1e-05, %v2134_v41 }
 0xa8b   : > { %2866 = vrsqrt.f32 %v2136_v37 }
 0xa93   : > { %v2865_v38 = vpop.eup %2864 }
 0xa94   : > { %v2139_v42 = vmul.f32 %v2865_v38, %v2123_v27 }
 0xa95   : > { %v2867_v6 = vpop.eup %2866 }
 0xa96   : > { %v2147_v44 = vmul.f32 %v2481_v5, %v2139_v42  ;;  %v2140_v45 = vmul.f32 %v2867_v6, %v2124_v29 }
 0xa98   : > { %v2148_v46 = vmul.f32 %v2481_v5, %v2140_v45  ;;  %v2155_v47 = vadd.f32 %v2482_v43, %v2147_v44 }
 0xa9a   : > { %v2156_v48 = vadd.f32 %v2482_v43, %v2148_v46  ;;  %2157 = vst.msk [vmem:[#allocation2] sm:$0xff] %vm804_vm2, %v2155_v47  ;;  %v2494_v49 = vpack.c.bf16 %v2155_v47, %v2155_v47 }
 0xa9c   : > { %2158 = vst.msk [vmem:[#allocation2 + $0x8] sm:$0xff] %vm804_vm2, %v2156_v48  ;;  %v2495_v50 = vpack.c.bf16 %v2156_v48, %v2156_v48 }
 0xa9d   : > { %2168 = vst.msk [vmem:[%s3454_s11] sm:$0xf] %vm2167_vm8, %v2494_v49 }
 0xa9e   : > { %2169 = vst.msk [vmem:[%s3454_s11 + $0x4] sm:$0xf] %vm2167_vm8, %v2495_v50 }
 0xa9f   : > { %2997 = shalt.err (!%p2994_p0)
}
 0xaa0   : > { %s2998_s11 = scalar_lea.hbm %s3713_s3, 128  ;;  %s3002_s22 = scalar_lea.hbm %s3865_s28, 256 }
 0xaa1   : > { %p2999_p5 = scmp.ne.s32.totalorder %s3713_s3, %s2998_s11  ;;  %p3003_p7 = scmp.lt.u32.totalorder %s3713_s3, %s3865_s28 }
 0xaa2   : > { %p3004_p4 = scmp.lt.u32.totalorder %s3002_s22, %s2998_s11  ;;  %p3006_p1 = scmp.lt.u32.totalorder %s2998_s11, %s3713_s3 }
 0xaa3   : > { %p3000_p9 = pnand %p2999_p5, %p3866_p3 }
 0xaa4   : > { %p3005_p6 = por %p3004_p4, %p3003_p7 }
 0xaa5   : > { %p3001_p2 = pneg %p3000_p9 }
 0xaa6   : > { %p3007_p13 = por %p3006_p1, %p3005_p6 }
 0xaa8   : > { %p3008_p10 = pnand %p3007_p13, %p3001_p2 }
 0xaaa   : > { %3011 = shalt.err (!%p3008_p10)
}
 0xaab   : > { %s3096_s23 = smov 4  }
 0xaac   : > { %2696 = dma.vmem_to_hbm [thread:$0]  (%p3866_p3), %s3717_s27, 128, %s3713_s3, %s2171_s21, %s3090_s12, %s3090_s12, %s3096_s23  }
 0xaad PF: > { %s3867_s15 = sld [smem:[#allocation15_spill]]  ;;  %s3868_s24 = sld [smem:[#allocation19_spill]] }
 0xaae   : > { %s3869_s17 = sld [smem:[#allocation18_spill]] }
 0xab3   : > { %s2201_s29 = sand.u32 1, %s3867_s15   ;;  %p3870_p8 = scmp.ne.s32.totalorder %s3868_s24, 0 }
 0xab4   : > { %p3871_p12 = scmp.ge.s32.totalorder %s3869_s17, 2  ;;  %s2202_s16 = scalar_lea.sflag [#allocation5], %s2201_s29 }
 0xab6   : > { %p2713_p11 = pnand %p3871_p12, %p3870_p8 }
 0xab8   : > { %3049 = dma.done.wait (!%p2713_p11), %s2202_s16, 128  }
 0xab9   : > { %3051 = vsyncadd (!%p2713_p11), %s2202_s16, 4294967168  ;;  %s30_s23 = sadd.s32 1, %s3869_s17   ;;  %s3872_s0 = sld [smem:[#allocation16_spill]] }
 0xaba   : > { %p27_p0 = scmp.ge.s32.totalorder %s30_s23, 4   ;;  %s3873_s20 = sld [smem:[#allocation22_spill]] }
 0xabb   : > { %s3874_s21 = sld [smem:[#allocation17_spill]]  ;;  %s3875_s22 = sld [smem:[#allocation20_spill]] }
 0xabc   : > { %s3876_s18 = smov %s3058_s19  ;;  %29 = sbr.rel (!%p27_p0) target bundleno = 19 (0x13), region = 181 }
 0xabf   : > { %s3877_s19 = smov %s3872_s0 }
 0xac3   :  { %2207 = vsyncpa [#allocation4], 1 }
 0xac4   :  { %2209 = vsyncpa [#allocation4 + $0x1], 1 }
 0xac5   :  { %2210 = vsyncpa [#allocation7], 1 }
 0xac6   :  { %2211 = vsyncpa [#allocation5], 1 }
 0xac7   :  { %2213 = vsyncpa [#allocation5 + $0x1], 1 }

</bundles_post_ra>
